<compile_context>
chip_gen: v6e
topology: v6e:2x2x1
jax: 0.10.0
libtpu: 0.0.40
codegen_flags: <defaults>
</compile_context>

<pallas_src>
import functools

import jax
import jax.numpy as jnp
from jax.experimental import pallas as pl
from jax.experimental.pallas import tpu as pltpu


def _round_up(x, m):
    return ((x + m - 1) // m) * m


def _grouped_vmem_limit():
    """Physical VMEM minus headroom (review: ~48 MiB v7x, ~112 MiB v5e/v6e)."""
    try:
        cap = pltpu.get_tpu_info().vmem_capacity_bytes
    except Exception:
        cap = 64 * 1024 * 1024
    return max(int(cap) - 16 * 1024 * 1024, 32 * 1024 * 1024)


# ---------------------------------------------------------------------------
# One-time weight preparation (do this at weight-load time, NOT per step).
# ---------------------------------------------------------------------------
def prepare_moe_params(params, *, tf):
    """Collapse the router and fuse gate/up expert weights for the kernels.

    * gate_w12 = gate_w1 @ gate_w2 is exact algebra because the torch gate is
      nn.Sequential(Linear, Linear) with NO nonlinearity in between.
    * wgu is (E, H, 2F) with per-tf-tile interleaving: tile j of width 2*tf
      holds [gate_proj tile j | up_proj tile j], so one MXU matmul per grid
      step produces both activations.
    """
    gate_w12 = jnp.dot(params["gate_w1"], params["gate_w2"],
                       preferred_element_type=jnp.float32)
    wg, wu = params["wg"], params["wu"]
    E, H, F = wg.shape
    assert F % tf == 0, "tf must divide intermediate_size"
    nt = F // tf
    wgu = jnp.concatenate(
        [wg.reshape(E, H, nt, tf), wu.reshape(E, H, nt, tf)], axis=-1
    ).reshape(E, H, 2 * F)
    return {"gate_w12": gate_w12, "wgu": wgu, "wd": params["wd"]}


# ---------------------------------------------------------------------------
# Router kernel: logits = x @ W12, tiled over token blocks (lane-dense store).
# ---------------------------------------------------------------------------
def gate_kernel(x_ref, w_ref, out_ref):
    out_ref[...] = jnp.dot(x_ref[...], w_ref[...],
                           preferred_element_type=jnp.float32)


def gate_logits(x, w12, *, tm=128):
    T, H = x.shape
    E = w12.shape[1]
    E_pad = _round_up(max(E, 128), 128)          # lane-dense output store
    Tp = _round_up(T, tm)
    x_p = jnp.pad(x, ((0, Tp - T), (0, 0))) if Tp != T else x
    w_p = jnp.pad(w12, ((0, 0), (0, E_pad - E))) if E_pad != E else w12
    out = pl.pallas_call(
        gate_kernel,
        out_shape=jax.ShapeDtypeStruct((Tp, E_pad), jnp.float32),
        grid_spec=pltpu.PrefetchScalarGridSpec(
            num_scalar_prefetch=0,
            grid=(Tp // tm,),
            in_specs=[
                pl.BlockSpec((tm, H), lambda i: (i, 0)),       # token tile
                pl.BlockSpec((H, E_pad), lambda i: (0, 0)),    # W12 resident (H*128*4B)
            ],
            out_specs=pl.BlockSpec((tm, E_pad), lambda i: (i, 0)),
        ),
        compiler_params=pltpu.CompilerParams(
            dimension_semantics=("parallel",)),
    )(x_p, w_p)
    return out[:T, :E]


# ---------------------------------------------------------------------------
# Grouped expert kernel (megablox-style grouped matmul, fused SiLU-MLP).
#   grid = (row_blocks, F // tf); each row block maps to exactly one expert,
#   identified by the scalar-prefetched block_expert array; block_valid gates
#   out the dummy trailing blocks of the static grid bound.
# ---------------------------------------------------------------------------
def moe_gmm_kernel(be_ref, bv_ref, x_ref, rw_ref, wgu_ref, wd_ref, out_ref, acc_ref):
    del be_ref                       # consumed only by the BlockSpec index_maps
    i = pl.program_id(0)
    j = pl.program_id(1)             # F-tile index (reduction for the down proj)
    nj = pl.num_programs(1)
    tf = wd_ref.shape[1]
    valid = bv_ref[i] != 0

    @pl.when(j == 0)
    def _():
        acc_ref[...] = jnp.zeros_like(acc_ref)

    @pl.when(valid)
    def _():
        x = x_ref[...]                                                  # [tm, H]   bf16
        gu = jnp.dot(x, wgu_ref[0], preferred_element_type=jnp.float32)  # [tm, 2tf] f32
        g = gu[:, :tf]
        u = gu[:, tf:]
        # SiLU(gate) * up, per-row routing weight folded in (padding rows have
        # weight 0 -> contribute exactly 0).
        h = (g * jax.nn.sigmoid(g)) * u * rw_ref[...]                   # [tm, tf]  f32
        acc_ref[...] += jnp.dot(h.astype(x.dtype), wd_ref[0],
                                preferred_element_type=jnp.float32)     # [tm, H]   f32

    @pl.when(j == nj - 1)
    def _():
        out_ref[...] = acc_ref[...].astype(out_ref.dtype)   # bf16 HBM writeback


def moe_grouped_experts(x_rows, row_w, block_expert, block_valid, wgu, wd,
                        *, tm, tf, vmem_limit_bytes=None, weight_buffers=None):
    G, H = x_rows.shape
    E, F, _ = wd.shape
    assert G % tm == 0 and F % tf == 0 and H % 128 == 0
    assert wgu.shape == (E, H, 2 * F)
    nj = F // tf
    last_j = nj - 1
    if vmem_limit_bytes is None:
        vmem_limit_bytes = _grouped_vmem_limit()

    # For invalid (dummy) blocks the weight index_maps repeat the previous grid
    # step's block index, so Pallas skips their weight DMAs entirely.
    def wgu_map(i, j, be, bv):
        return (be[i], 0, jnp.where(bv[i] != 0, j, last_j))

    def wd_map(i, j, be, bv):
        return (be[i], jnp.where(bv[i] != 0, j, last_j), 0)

    weight_kwargs = {}
    if weight_buffers is not None and weight_buffers != 2:
        # e.g. v5e: pl.Buffered(3) hides weight-DMA jitter on the slower HBM.
        weight_kwargs["pipeline_mode"] = pl.Buffered(weight_buffers)

    cost = pl.CostEstimate(
        flops=6 * G * H * F,                     # gate+up (4*G*H*F) + down (2*G*F*H)
        transcendentals=G * F,                   # sigmoid
        bytes_accessed=(2 * G * H * 2)           # x read + bf16 out write
        + G * 4                                  # routing weights
        + (G // tm) * 3 * H * F * 2,             # streamed bf16 expert weights
    )

    return pl.pallas_call(
        moe_gmm_kernel,
        out_shape=jax.ShapeDtypeStruct((G, H), x_rows.dtype),
        grid_spec=pltpu.PrefetchScalarGridSpec(
            num_scalar_prefetch=2,               # block_expert, block_valid -> SMEM
            grid=(G // tm, nj),
            in_specs=[
                pl.BlockSpec((tm, H), lambda i, j, be, bv: (i, 0)),   # sorted tokens
                pl.BlockSpec((tm, 1), lambda i, j, be, bv: (i, 0)),   # routing weights
                pl.BlockSpec((1, H, 2 * tf), wgu_map, **weight_kwargs),  # [gate|up] tile
                pl.BlockSpec((1, tf, H), wd_map, **weight_kwargs),       # down tile
            ],
            out_specs=pl.BlockSpec((tm, H), lambda i, j, be, bv: (i, 0)),
            scratch_shapes=[pltpu.VMEM((tm, H), jnp.float32)],        # f32 accumulator
        ),
        compiler_params=pltpu.CompilerParams(
            dimension_semantics=("parallel", "arbitrary"),  # rows: megacore, F: reduction
            vmem_limit_bytes=vmem_limit_bytes,
        ),
        cost_estimate=cost,
    )(block_expert, block_valid, x_rows, row_w, wgu, wd)


# ---------------------------------------------------------------------------
# Routing glue: sort (token, expert) rows by expert, pad groups to tile size.
# ---------------------------------------------------------------------------
def _build_groups(top_idx, top_vals, T, E, K, tm):
    # TODO(synk): on v7x, check megacore balance of the row-block axis; if one
    # half of the grid gets all the dummy blocks / heavy experts, interleave
    # the real blocks round-robin across the two halves here.
    R = T * K
    row_expert = top_idx.reshape(-1).astype(jnp.int32)            # [T*K]
    row_weight = top_vals.reshape(-1).astype(jnp.float32)         # [T*K]
    row_token = jnp.repeat(jnp.arange(T, dtype=jnp.int32), K)     # [T*K]

    order = jnp.argsort(row_expert)                               # sort by expert
    s_expert = row_expert[order]
    s_token = row_token[order]
    s_weight = row_weight[order]

    counts = jnp.bincount(row_expert, length=E).astype(jnp.int32)  # rows per expert
    padded = ((counts + tm - 1) // tm) * tm                        # padded group sizes
    padded_csum = jnp.cumsum(padded)
    grp_start = jnp.concatenate(
        [jnp.zeros((1,), jnp.int32), padded_csum[:-1].astype(jnp.int32)])
    cnt_start = jnp.concatenate(
        [jnp.zeros((1,), jnp.int32), jnp.cumsum(counts)[:-1].astype(jnp.int32)])

    rank = jnp.arange(R, dtype=jnp.int32) - cnt_start[s_expert]    # pos inside group
    dest = grp_start[s_expert] + rank                              # row in padded layout

    num_blocks = (_round_up(R, tm) + E * tm) // tm                 # static upper bound
    G = num_blocks * tm
    row_token_p = jnp.zeros((G,), jnp.int32).at[dest].set(s_token)       # pads -> token 0
    row_weight_p = jnp.zeros((G,), jnp.float32).at[dest].set(s_weight)   # pads -> weight 0

    total_rows = padded_csum[-1]                                   # real (padded) rows
    block_start = jnp.arange(num_blocks, dtype=jnp.int32) * tm
    block_valid = (block_start < total_rows).astype(jnp.int32)
    block_expert = jnp.searchsorted(padded_csum, block_start, side="right")
    block_expert = jnp.minimum(block_expert, E - 1).astype(jnp.int32)
    # Dummy trailing blocks inherit the last real block's expert so their
    # (frozen) weight block index matches the previous grid step -> DMA skipped.
    last_real = jnp.maximum(total_rows // tm - 1, 0)
    block_expert = jnp.where(block_valid == 1, block_expert,
                             block_expert[last_real]).astype(jnp.int32)
    return row_token_p, row_weight_p, block_expert, block_valid


# ---------------------------------------------------------------------------
# Full forward
# ---------------------------------------------------------------------------
def llama_sparse_moe_block(hidden_states, prepared, top_k, *, tm=512, tf=512,
                           gate_tm=128, vmem_limit_bytes=None, weight_buffers=None):
    """Returns (final_hidden_states [B,S,H] in hidden dtype, router_logits [T,E] f32).

    `prepared` comes from prepare_moe_params (one-time weight-layout prep).
    """
    # TODO(synk): training-mode jitter noise is not implemented (eval path only).
    B, S, H = hidden_states.shape
    T = B * S
    E = prepared["gate_w12"].shape[1]
    x = hidden_states.reshape(T, H)

    # ---- router (f32, collapsed W1@W2) + softmax / top-k / renorm (JAX glue) ----
    logits = gate_logits(x.astype(jnp.float32), prepared["gate_w12"], tm=gate_tm)
    routing = jax.nn.softmax(logits, axis=-1)
    top_vals, top_idx = jax.lax.top_k(routing, top_k)
    top_vals = top_vals / jnp.sum(top_vals, axis=-1, keepdims=True)

    # ---- grouped expert compute (only routed tokens, only hit experts) ----
    row_token, row_weight, block_expert, block_valid = _build_groups(
        top_idx, top_vals, T, E, top_k, tm)
    # TODO(synk): fold this [G,H] gather (and the final scatter-add) into the
    # grouped kernel via a scalar-prefetched row_token table + manual DMA gather
    # (memory_space=pl.ANY on x + make_async_copy) to overlap it with compute.
    x_rows = x.astype(jnp.bfloat16)[row_token]                        # [G, H] gather
    y_rows = moe_grouped_experts(x_rows, row_weight[:, None],
                                 block_expert, block_valid,
                                 prepared["wgu"], prepared["wd"],
                                 tm=tm, tf=tf,
                                 vmem_limit_bytes=vmem_limit_bytes,
                                 weight_buffers=weight_buffers)       # [G, H] bf16
    # Each token gets top_k contributions; padded/dummy rows are exactly 0.
    out = jnp.zeros((T, H), jnp.float32).at[row_token].add(y_rows.astype(jnp.float32))
    return out.astype(hidden_states.dtype).reshape(B, S, H), logits


# ---------------------------------------------------------------------------
# Pure-JAX references (same math, no Pallas) for correctness checks
# ---------------------------------------------------------------------------
def ref_gate(hidden_states, params):
    B, S, H = hidden_states.shape
    x = hidden_states.reshape(-1, H).astype(jnp.float32)
    h = jnp.dot(x, params["gate_w1"], preferred_element_type=jnp.float32)
    return jnp.dot(h, params["gate_w2"], preferred_element_type=jnp.float32)


def ref_experts(hidden_states, params, logits, top_k):
    """Dense-weighted sum over experts: identical math to the torch sparse loop."""
    B, S, H = hidden_states.shape
    T = B * S
    x = hidden_states.reshape(T, H).astype(jnp.bfloat16)
    routing = jax.nn.softmax(logits.astype(jnp.float32), axis=-1)
    tv, ti = jax.lax.top_k(routing, top_k)
    tv = tv / jnp.sum(tv, axis=-1, keepdims=True)
    E = logits.shape[-1]
    wfull = jnp.zeros((T, E), jnp.float32).at[jnp.arange(T)[:, None], ti].set(tv)
    out = jnp.zeros((T, H), jnp.float32)
    for e in range(E):
        g = jnp.dot(x, params["wg"][e], preferred_element_type=jnp.float32)
        u = jnp.dot(x, params["wu"][e], preferred_element_type=jnp.float32)
        h = (g * jax.nn.sigmoid(g)) * u * wfull[:, e:e + 1]
        out = out + jnp.dot(h.astype(jnp.bfloat16), params["wd"][e],
                            preferred_element_type=jnp.float32)
    return out.astype(hidden_states.dtype).reshape(B, S, H)


# ---------------------------------------------------------------------------
if __name__ == "__main__":
    B, S = 4, 64                  # batch, sequence  -> T = 256 tokens
    H, F = 256, 512               # hidden_size, intermediate_size
    E, K = 8, 2                   # num_experts, num_experts_per_tok
    TM, TF = 128, 256             # small tiles for the toy shapes (see sizing notes)

    key = jax.random.PRNGKey(0)
    ks = jax.random.split(key, 6)
    scale = 0.05
    params = {
        # router kept in f32 (tiny cost; standard practice for MoE routers)
        "gate_w1": jax.random.normal(ks[0], (H, H), jnp.float32) * scale,
        "gate_w2": jax.random.normal(ks[1], (H, E), jnp.float32) * scale,
        # expert weights in bf16 for the MXU (f32 accumulation inside the kernel)
        "wg": (jax.random.normal(ks[2], (E, H, F), jnp.float32) * scale).astype(jnp.bfloat16),
        "wu": (jax.random.normal(ks[3], (E, H, F), jnp.float32) * scale).astype(jnp.bfloat16),
        "wd": (jax.random.normal(ks[4], (E, F, H), jnp.float32) * scale).astype(jnp.bfloat16),
    }
    x = jax.random.normal(ks[5], (B, S, H), jnp.float32)

    # One-time weight prep (done at load time in production, outside the step fn).
    prepared = prepare_moe_params(params, tf=TF)
    jax.block_until_ready(prepared)

    fwd = jax.jit(functools.partial(llama_sparse_moe_block, top_k=K, tm=TM, tf=TF))
    out, logits = fwd(x, prepared)
    jax.block_until_ready((out, logits))

    assert out.shape == (B, S, H) and logits.shape == (B * S, E)

    # Collapsed-gate logits vs the two-step reference: associativity differs and
    # TPU default f32 matmul precision is bf16-pass, hence the looser atol.
    logits_ref = ref_gate(x, params)
    assert jnp.allclose(logits, logits_ref, rtol=5e-2, atol=2e-2), (
        "logits mismatch: %g" % float(jnp.max(jnp.abs(logits - logits_ref))))

    # Expert path is checked with the same routing decisions (the Pallas logits),
    # so a near-tie in top-k cannot make this comparison flaky.  Kernel output
    # rows are bf16 (review), combine stays f32.
    out_ref = ref_experts(x, params, logits, K)
    assert jnp.allclose(out, out_ref, rtol=3e-2, atol=5e-3), (
        "output mismatch: %g" % float(jnp.max(jnp.abs(out - out_ref))))

    print("KERNEL_OK")
</pallas_src>

<mosaic_0001>
module attributes {stable_mosaic.version = 11 : i64} {
  func.func private @main(%arg0: i32) attributes {dimension_semantics = [#tpu.dimension_semantics<core_parallel>], iteration_bounds = array<i64: 2>, tpu.core_type = #tpu.core_type<sc_scalar_subcore>, window_params = []} {
    return
  }
}

module attributes {stable_mosaic.version = 11 : i64} {
  func.func private @main(%arg0: i32) attributes {dimension_semantics = [#tpu.dimension_semantics<core_parallel>], iteration_bounds = array<i64: 2>, tpu.core_type = #tpu.core_type<sc_scalar_subcore>, window_params = []} {
    return
  }
}

module attributes {stable_mosaic.version = 11 : i64} {
  func.func @gate_kernel(%arg0: i32, %arg1: memref<128x256xf32, #tpu.memory_space<vmem>>, %arg2: memref<256x128xf32, #tpu.memory_space<vmem>>, %arg3: memref<128x128xf32, #tpu.memory_space<vmem>>) attributes {dimension_semantics = [#tpu.dimension_semantics<parallel>], iteration_bounds = array<i64: 2>, scalar_prefetch = 0 : i64, scratch_operands = 0 : i64, tpu.core_type = #tpu.core_type<tc>, window_params = [{transform_indices = @transform_0, window_bounds = array<i64: 128, 256>}, {pipeline_mode = #tpu.pipeline_mode<synchronous>, transform_indices = @transform_1, window_bounds = array<i64: 256, 128>}, {transform_indices = @transform_2, window_bounds = array<i64: 128, 128>}]} {
    %c0 = arith.constant 0 : index
    %c0_0 = arith.constant 0 : index
    %0 = vector.load %arg1[%c0, %c0_0] : memref<128x256xf32, #tpu.memory_space<vmem>>, vector<128x256xf32>
    %c0_1 = arith.constant 0 : index
    %c0_2 = arith.constant 0 : index
    %1 = vector.load %arg2[%c0_1, %c0_2] : memref<256x128xf32, #tpu.memory_space<vmem>>, vector<256x128xf32>
    %cst = arith.constant dense<0.000000e+00> : vector<128x128xf32>
    %2 = tpu.matmul %0, %1, %cst {dimension_numbers = #tpu.dot_dimension_numbers<[1], [0], [0], [1], [0, 0, 1, 1], [], []>} : vector<128x256xf32>, vector<256x128xf32>, vector<128x128xf32> -> vector<128x128xf32>
    %c0_3 = arith.constant 0 : index
    %c0_4 = arith.constant 0 : index
    %3 = vector.load %arg3[%c0_3, %c0_4] : memref<128x128xf32, #tpu.memory_space<vmem>>, vector<128x128xf32>
    tpu.vector_store %arg3[%c0_3, %c0_4], %2 {strides = array<i32>} : memref<128x128xf32, #tpu.memory_space<vmem>>, vector<128x128xf32>,
    return
  }
  func.func @transform_0(%arg0: i32) -> (i32, i32) {
    %c0_i32 = arith.constant 0 : i32
    %c0_i32_0 = arith.constant 0 : i32
    return %arg0, %c0_i32 : i32, i32
  }
  func.func @transform_1(%arg0: i32) -> (i32, i32) {
    %c0_i32 = arith.constant 0 : i32
    %c0_i32_0 = arith.constant 0 : i32
    %c0_i32_1 = arith.constant 0 : i32
    return %c0_i32, %c0_i32_0 : i32, i32
  }
  func.func @transform_2(%arg0: i32) -> (i32, i32) {
    %c0_i32 = arith.constant 0 : i32
    %c0_i32_0 = arith.constant 0 : i32
    return %arg0, %c0_i32 : i32, i32
  }
}

module attributes {stable_mosaic.version = 11 : i64} {
  func.func @moe_gmm_kernel(%arg0: i32, %arg1: i32, %arg2: memref<12xi32, #tpu.memory_space<smem>>, %arg3: memref<12xi32, #tpu.memory_space<smem>>, %arg4: memref<128x256xbf16, #tpu.memory_space<vmem>>, %arg5: memref<128x1xf32, #tpu.memory_space<vmem>>, %arg6: memref<1x256x512xbf16, #tpu.memory_space<vmem>>, %arg7: memref<1x256x256xbf16, #tpu.memory_space<vmem>>, %arg8: memref<128x256xbf16, #tpu.memory_space<vmem>>, %arg9: memref<128x256xf32, #tpu.memory_space<vmem>>) attributes {dimension_semantics = [#tpu.dimension_semantics<parallel>, #tpu.dimension_semantics<arbitrary>], iteration_bounds = array<i64: 12, 2>, scalar_prefetch = 2 : i64, scratch_operands = 1 : i64, tpu.core_type = #tpu.core_type<tc>, window_params = [{transform_indices = @transform_0, window_bounds = array<i64: 128, 256>}, {transform_indices = @transform_1, window_bounds = array<i64: 128, 1>}, {transform_indices = @transform_2, window_bounds = array<i64: 1, 256, 512>}, {transform_indices = @transform_3, window_bounds = array<i64: 1, 256, 256>}, {transform_indices = @transform_4, window_bounds = array<i64: 128, 256>}]} {
    %0 = arith.index_cast %arg0 : i32 to index
    %1 = memref.load %arg3[%0] : memref<12xi32, #tpu.memory_space<smem>>
    %c0_i32 = arith.constant 0 : i32
    %2 = arith.cmpi ne, %1, %c0_i32 : i32
    %c0_i32_0 = arith.constant 0 : i32
    %3 = arith.cmpi eq, %arg1, %c0_i32_0 : i32
    %4 = arith.extui %3 : i1 to i32
    %c0_i32_1 = arith.constant 0 : i32
    %5 = arith.cmpi ne, %4, %c0_i32_1 : i32
    scf.if %5 {
      %cst = arith.constant 0.000000e+00 : f32
      %11 = vector.broadcast %cst : f32 to vector<128x256xf32>
      %c0 = arith.constant 0 : index
      %c0_4 = arith.constant 0 : index
      %12 = vector.load %arg9[%c0, %c0_4] : memref<128x256xf32, #tpu.memory_space<vmem>>, vector<128x256xf32>
      tpu.vector_store %arg9[%c0, %c0_4], %11 {strides = array<i32>} : memref<128x256xf32, #tpu.memory_space<vmem>>, vector<128x256xf32>,
    } else {
    }
    %6 = arith.extui %2 : i1 to i32
    %c0_i32_2 = arith.constant 0 : i32
    %7 = arith.cmpi ne, %6, %c0_i32_2 : i32
    scf.if %7 {
      %c0 = arith.constant 0 : index
      %c0_4 = arith.constant 0 : index
      %11 = vector.load %arg4[%c0, %c0_4] : memref<128x256xbf16, #tpu.memory_space<vmem>>, vector<128x256xbf16>
      %c0_5 = arith.constant 0 : index
      %c0_6 = arith.constant 0 : index
      %c0_7 = arith.constant 0 : index
      %12 = vector.load %arg6[%c0_5, %c0_6, %c0_7] : memref<1x256x512xbf16, #tpu.memory_space<vmem>>, vector<1x256x512xbf16>
      %13 = vector.shape_cast %12 : vector<1x256x512xbf16> to vector<256x512xbf16>
      %cst = arith.constant dense<0.000000e+00> : vector<128x512xf32>
      %14 = tpu.matmul %11, %13, %cst {dimension_numbers = #tpu.dot_dimension_numbers<[1], [0], [0], [1], [0, 0, 1, 1], [], []>} : vector<128x256xbf16>, vector<256x512xbf16>, vector<128x512xf32> -> vector<128x512xf32>
      %15 = vector.extract_strided_slice %14 {offsets = [0, 0], sizes = [128, 256], strides = [1, 1]} : vector<128x512xf32> to vector<128x256xf32>
      %16 = vector.extract_strided_slice %14 {offsets = [0, 256], sizes = [128, 256], strides = [1, 1]} : vector<128x512xf32> to vector<128x256xf32>
      %17 = arith.negf %15 : vector<128x256xf32>
      %18 = math.exp %17 : vector<128x256xf32>
      %cst_8 = arith.constant 1.000000e+00 : f32
      %19 = vector.broadcast %cst_8 : f32 to vector<128x256xf32>
      %20 = arith.addf %19, %18 : vector<128x256xf32>
      %21 = arith.divf %19, %20 : vector<128x256xf32>
      %22 = arith.mulf %15, %21 : vector<128x256xf32>
      %23 = arith.mulf %22, %16 : vector<128x256xf32>
      %c0_9 = arith.constant 0 : index
      %c0_10 = arith.constant 0 : index
      %24 = vector.load %arg5[%c0_9, %c0_10] : memref<128x1xf32, #tpu.memory_space<vmem>>, vector<128x1xf32>
      %25 = vector.broadcast %24 : vector<128x1xf32> to vector<128x256xf32>
      %26 = arith.mulf %23, %25 : vector<128x256xf32>
      %c0_11 = arith.constant 0 : index
      %c0_12 = arith.constant 0 : index
      %27 = vector.load %arg9[%c0_11, %c0_12] : memref<128x256xf32, #tpu.memory_space<vmem>>, vector<128x256xf32>
      %28 = arith.truncf %26 : vector<128x256xf32> to vector<128x256xbf16>
      %c0_13 = arith.constant 0 : index
      %c0_14 = arith.constant 0 : index
      %c0_15 = arith.constant 0 : index
      %29 = vector.load %arg7[%c0_13, %c0_14, %c0_15] : memref<1x256x256xbf16, #tpu.memory_space<vmem>>, vector<1x256x256xbf16>
      %30 = vector.shape_cast %29 : vector<1x256x256xbf16> to vector<256x256xbf16>
      %cst_16 = arith.constant dense<0.000000e+00> : vector<128x256xf32>
      %31 = tpu.matmul %28, %30, %cst_16 {dimension_numbers = #tpu.dot_dimension_numbers<[1], [0], [0], [1], [0, 0, 1, 1], [], []>} : vector<128x256xbf16>, vector<256x256xbf16>, vector<128x256xf32> -> vector<128x256xf32>
      %32 = arith.addf %27, %31 : vector<128x256xf32>
      %c0_17 = arith.constant 0 : index
      %c0_18 = arith.constant 0 : index
      %33 = vector.load %arg9[%c0_17, %c0_18] : memref<128x256xf32, #tpu.memory_space<vmem>>, vector<128x256xf32>
      tpu.vector_store %arg9[%c0_17, %c0_18], %32 {strides = array<i32>} : memref<128x256xf32, #tpu.memory_space<vmem>>, vector<128x256xf32>,
    } else {
    }
    %c1_i32 = arith.constant 1 : i32
    %8 = arith.cmpi eq, %arg1, %c1_i32 : i32
    %9 = arith.extui %8 : i1 to i32
    %c0_i32_3 = arith.constant 0 : i32
    %10 = arith.cmpi ne, %9, %c0_i32_3 : i32
    scf.if %10 {
      %c0 = arith.constant 0 : index
      %c0_4 = arith.constant 0 : index
      %11 = vector.load %arg9[%c0, %c0_4] : memref<128x256xf32, #tpu.memory_space<vmem>>, vector<128x256xf32>
      %12 = arith.truncf %11 : vector<128x256xf32> to vector<128x256xbf16>
      %c0_5 = arith.constant 0 : index
      %c0_6 = arith.constant 0 : index
      %13 = vector.load %arg8[%c0_5, %c0_6] : memref<128x256xbf16, #tpu.memory_space<vmem>>, vector<128x256xbf16>
      tpu.vector_store %arg8[%c0_5, %c0_6], %12 {strides = array<i32>} : memref<128x256xbf16, #tpu.memory_space<vmem>>, vector<128x256xbf16>,
    } else {
    }
    return
  }
  func.func @transform_0(%arg0: i32, %arg1: i32, %arg2: memref<12xi32, #tpu.memory_space<smem>>, %arg3: memref<12xi32, #tpu.memory_space<smem>>) -> (i32, i32) {
    %c0_i32 = arith.constant 0 : i32
    %c0_i32_0 = arith.constant 0 : i32
    return %arg0, %c0_i32 : i32, i32
  }
  func.func @transform_1(%arg0: i32, %arg1: i32, %arg2: memref<12xi32, #tpu.memory_space<smem>>, %arg3: memref<12xi32, #tpu.memory_space<smem>>) -> (i32, i32) {
    %c0_i32 = arith.constant 0 : i32
    %c0_i32_0 = arith.constant 0 : i32
    return %arg0, %c0_i32 : i32, i32
  }
  func.func @transform_2(%arg0: i32, %arg1: i32, %arg2: memref<12xi32, #tpu.memory_space<smem>>, %arg3: memref<12xi32, #tpu.memory_space<smem>>) -> (i32, i32, i32) {
    %0 = arith.index_cast %arg0 : i32 to index
    %1 = memref.load %arg2[%0] : memref<12xi32, #tpu.memory_space<smem>>
    %2 = arith.index_cast %arg0 : i32 to index
    %3 = memref.load %arg3[%2] : memref<12xi32, #tpu.memory_space<smem>>
    %c0_i32 = arith.constant 0 : i32
    %4 = arith.cmpi ne, %3, %c0_i32 : i32
    %c1_i32 = arith.constant 1 : i32
    %5 = arith.select %4, %arg1, %c1_i32 : i32
    %c0_i32_0 = arith.constant 0 : i32
    %c0_i32_1 = arith.constant 0 : i32
    return %1, %c0_i32_0, %5 : i32, i32, i32
  }
  func.func @transform_3(%arg0: i32, %arg1: i32, %arg2: memref<12xi32, #tpu.memory_space<smem>>, %arg3: memref<12xi32, #tpu.memory_space<smem>>) -> (i32, i32, i32) {
    %0 = arith.index_cast %arg0 : i32 to index
    %1 = memref.load %arg2[%0] : memref<12xi32, #tpu.memory_space<smem>>
    %2 = arith.index_cast %arg0 : i32 to index
    %3 = memref.load %arg3[%2] : memref<12xi32, #tpu.memory_space<smem>>
    %c0_i32 = arith.constant 0 : i32
    %4 = arith.cmpi ne, %3, %c0_i32 : i32
    %c1_i32 = arith.constant 1 : i32
    %5 = arith.select %4, %arg1, %c1_i32 : i32
    %c0_i32_0 = arith.constant 0 : i32
    %c0_i32_1 = arith.constant 0 : i32
    return %1, %5, %c0_i32_0 : i32, i32, i32
  }
  func.func @transform_4(%arg0: i32, %arg1: i32, %arg2: memref<12xi32, #tpu.memory_space<smem>>, %arg3: memref<12xi32, #tpu.memory_space<smem>>) -> (i32, i32) {
    %c0_i32 = arith.constant 0 : i32
    %c0_i32_0 = arith.constant 0 : i32
    return %arg0, %c0_i32 : i32, i32
  }
}

</mosaic_0001>

<bundles_post_ra>
// kernel: custom-call.1
= control target key start
LH: loop header
LB: loop body
LE: loop exit
PB: predicated region body
PF: predicated region fallthrough
CT: control target
= control target key end

     0   :  { %s6_s0 = inlined_call_operand.vmem [shape: u32[12], index: 0, kind: output, shape index: {}]  }

// kernel: llama_sparse_moe_block.2
= control target key start
LH: loop header
LB: loop body
LE: loop exit
PB: predicated region body
PF: predicated region fallthrough
CT: control target
= control target key end

     0   :  { %7 = vsyncpa [#allocation3], 0  ;;  %s958_s0 = inlined_call_operand.hbm [shape: f32[256,256], index: 0, kind: input, shape index: {}]   ;;  %s959_s1 = inlined_call_operand.vmem [shape: f32[256,128], index: 1, kind: input, shape index: {}]   ;;  %s960_s2 = inlined_call_operand.vmem [shape: f32[256,128], index: 2, kind: output, shape index: {}]  }
   0x1   :  { %9 = vsyncpa [#allocation3 + $0x1], 0  ;;  %s710_s9 = smov 0   ;;  %s712_s10 = smov 0  }
   0x2   :  { %s714_s11 = smov 0   ;;  %s716_s12 = smov 0  }
   0x3 LB: > { %s459_s13 = sadd.s32 4294967295, %s690_s12   ;;  %s730_s14 = sadd.s32 1, %s690_s12   ;;  %s690_s12 = sphi %s716_s12, %s969_s12   ;;  %s686_s11 = sphi %s714_s11, %s968_s11   ;;  %s682_s10 = sphi %s712_s10, %s967_s10   ;;  %s678_s9 = sphi %s710_s9, %s966_s9  }
   0x4   : > { %s19_s15 = ssub.s32 %s690_s12, %s730_s14  ;;  %s22_s16 = sadd.s32 1, %s686_s11 }
   0x5   : > { %p20_p0 = scmp.eq.s32.totalorder %s19_s15, 0  ;;  %p29_p1 = scmp.ne.s32.totalorder %s686_s11, %s682_s10 }
   0x6   : > { %p30_p2 = scmp.eq.s32.totalorder %s690_s12, 0  ;;  %p35_p3 = scmp.ne.s32.totalorder %s682_s10, %s678_s9 }
   0x7   : > { %s740_s17 = scalar_select %p20_p0, %s686_s11, %s22_s16  }
   0x8   : > { %p31_p4 = por %p30_p2, %p29_p1  ;;  %p36_p5 = scmp.eq.s32.totalorder %s459_s13, 0 }
   0x9   : > { %p593_p6 = scmp.lt.s32.totalorder %s690_s12, 2  ;;  %s109_s19 = sand.u32 1, %s686_s11  }
   0xa   : > { %p745_p7 = por %p36_p5, %p35_p3  ;;  %s463_s20 = sshll.u32 %s109_s19, 8 }
   0xb   : > { %s474_s21 = sshll.u32 %s690_s12, 12  ;;  %s113_s25 = scalar_lea.vmem [#allocation2], %s463_s20 }
   0xc   : > { %s962_s18 = scalar_select %p745_p7, 1, 0 }
   0xd   : > { %s754_s24 = scalar_lea.hbm %s958_s0, %s474_s21  ;;  %s121_s26 = sshll.u32 %s113_s25, 4  ;;  %s756_s26 = int_to_ptr.vmem [resolvable:$true] %s121_s26 }
   0xe   : > { %p758_p8 = pnand %p593_p6, %p31_p4  ;;  %s763_s28 = scalar_lea.sflag [#allocation3], %s109_s19 }
   0xf   : > { %s628_s29 = scalar_lea.hbm %s754_s24, 4096  ;;  %s633_s4 = scalar_lea.hbm %s958_s0, 8192 }
  0x10   : > { %p629_p10 = scmp.ne.s32.totalorder %s754_s24, %s628_s29  ;;  %p630_p11 = pneg %p758_p8 }
  0x11   : > { %p634_p0 = scmp.lt.s32.totalorder %s754_s24, %s958_s0  ;;  %p635_p1 = scmp.lt.s32.totalorder %s633_s4, %s628_s29 }
  0x12   : > { %p631_p12 = pnand %p630_p11, %p629_p10 }
  0x13   : > { %p636_p2 = por %p635_p1, %p634_p0 }
  0x14   : > { %p632_p13 = pneg %p631_p12 }
  0x16   : > { %p637_p3 = pnand %p636_p2, %p632_p13 }
  0x18   : > { %640 = shalt.err (!%p637_p3)
}
  0x19   : > { %s641_s7 = scalar_lea.vmem %s756_s26, 4096  ;;  %s692_s8 = smov [#allocation2]  }
  0x1a   : > { %p642_p4 = scmp.ne.s32.totalorder %s756_s26, %s641_s7  ;;  %s646_s9 = sshll.u32 %s692_s8, 4  ;;  %s647_s9 = int_to_ptr.vmem [resolvable:$false] %s646_s9 }
  0x1b   : > { %s648_s15 = scalar_lea.vmem %s647_s9, 8192  ;;  %p649_p10 = scmp.lt.s32.totalorder %s756_s26, %s647_s9 }
  0x1c   : > { %p644_p5 = pnand %p642_p4, %p630_p11  ;;  %p650_p12 = scmp.lt.s32.totalorder %s648_s15, %s641_s7 }
  0x1e   : > { %p645_p6 = pneg %p644_p5  ;;  %p651_p9 = por %p650_p12, %p649_p10 }
  0x20   : > { %p652_p7 = pnand %p651_p9, %p645_p6 }
  0x22   : > { %655 = shalt.err (!%p652_p7)
}
  0x23   : > { %s693_s16 = smov 256   ;;  %s694_s19 = smov 16  }
  0x24   : > { %592 = dma.hbm_to_vmem [thread:$0]  (!%p758_p8), %s754_s24, 4096, %s756_s26, %s763_s28, %s693_s16, %s693_s16, %s694_s19  }
  0x25   : > { %p129_p11 = scmp.lt.s32.totalorder %s690_s12, 3  ;;  %p964_p13 = scmp.ge.s32.totalorder %s690_s12, 1 }
  0x27   : > { %p130_p0 = pnand %p964_p13, %p129_p11 }
  0x28   : > { %s135_s20 = sand.u32 (!%p130_p0), 1, %s682_s10   ;;  %p965_p7 = scmp.ne.s32.totalorder (!%p130_p0), %s962_s18, 0 }
  0x29   : > { %133 = sbr.rel (%p130_p0) target bundleno = 307 (0x133), region = 28  ;;  %s468_s21 = sshll.u32 (!%p130_p0), %s135_s20, 8 }
  0x2a   : > { %s136_s22 = scalar_lea.sflag (!%p130_p0), [#allocation3], %s135_s20  ;;  %s788_s23 = scalar_lea.vmem (!%p130_p0), [#allocation2], %s468_s21 }
  0x2e   : > { %673 = dma.done.wait (%p965_p7), %s136_s22, 4096  }
  0x2f   : > { %675 = vsyncadd (%p965_p7), %s136_s22, 4294963200  ;;  %v230_v0 = vld [vmem:[%s959_s1 + $0xf8] sm:$0xff]  ;;  %v229_v2 = vld [vmem:[%s959_s1 + $0xf0] sm:$0xff]  ;;  %s469_s29 = sshll.u32 %s459_s13, 4 }
  0x30   : > { %v214_v1 = vld [vmem:[%s959_s1 + $0x78] sm:$0xff]  ;;  %475 = vmatprep.subr.mxu0 %v230_v0  ;;  %555 = vmatprep.subr.mxu1 %v230_v0  ;;  %v213_v3 = vld [vmem:[%s959_s1 + $0x70] sm:$0xff]  ;;  %v228_v4 = vld [vmem:[%s959_s1 + $0xe8] sm:$0xff]  ;;  %p162_p8 = scmp.lt.s32.totalorder %s469_s29, 31 }
  0x31   : > { %476 = vmatpush3.msra.mxu0 %v214_v1  ;;  %571 = vmatpush3.msra.mxu1 %v214_v1  ;;  %v212_v5 = vld [vmem:[%s959_s1 + $0x68] sm:$0xff]  ;;  %v227_v6 = vld [vmem:[%s959_s1 + $0xe0] sm:$0xff]  ;;  %v226_v8 = vld [vmem:[%s959_s1 + $0xd8] sm:$0xff] }
  0x32   : > { %477 = vmatprep.subr.mxu0 %v229_v2  ;;  %556 = vmatprep.subr.mxu1 %v229_v2  ;;  %v211_v7 = vld [vmem:[%s959_s1 + $0x60] sm:$0xff]  ;;  %v210_v9 = vld [vmem:[%s959_s1 + $0x58] sm:$0xff]  ;;  %v225_v10 = vld [vmem:[%s959_s1 + $0xd0] sm:$0xff]  ;;  %s971_s29 = smov (!%p162_p8, %s469_s29), 31 }
  0x33   : > { %478 = vmatpush3.msra.mxu0 %v213_v3  ;;  %572 = vmatpush3.msra.mxu1 %v213_v3  ;;  %v209_v11 = vld [vmem:[%s959_s1 + $0x50] sm:$0xff]  ;;  %v224_v12 = vld [vmem:[%s959_s1 + $0xc8] sm:$0xff]  ;;  %v223_v14 = vld [vmem:[%s959_s1 + $0xc0] sm:$0xff]  ;;  %s470_s24 = sshll.u32 %s971_s29, 3 }
  0x34   : > { %479 = vmatprep.subr.mxu0 %v228_v4  ;;  %557 = vmatprep.subr.mxu1 %v228_v4  ;;  %v208_v13 = vld [vmem:[%s959_s1 + $0x48] sm:$0xff]  ;;  %v207_v15 = vld [vmem:[%s959_s1 + $0x40] sm:$0xff]  ;;  %v222_v16 = vld [vmem:[%s959_s1 + $0xb8] sm:$0xff]  ;;  %s927_s28 = scalar_lea.vmem %s960_s2, %s470_s24 }
  0x35   : > { %480 = vmatpush3.msra.mxu0 %v212_v5  ;;  %573 = vmatpush3.msra.mxu1 %v212_v5  ;;  %v206_v17 = vld [vmem:[%s959_s1 + $0x38] sm:$0xff]  ;;  %v221_v18 = vld [vmem:[%s959_s1 + $0xb0] sm:$0xff]  ;;  %v220_v20 = vld [vmem:[%s959_s1 + $0xa8] sm:$0xff] }
  0x36   : > { %481 = vmatprep.subr.mxu0 %v227_v6  ;;  %558 = vmatprep.subr.mxu1 %v227_v6  ;;  %v205_v19 = vld [vmem:[%s959_s1 + $0x30] sm:$0xff]  ;;  %v204_v21 = vld [vmem:[%s959_s1 + $0x28] sm:$0xff]  ;;  %v219_v22 = vld [vmem:[%s959_s1 + $0xa0] sm:$0xff] }
  0x37   : > { %482 = vmatpush3.msra.mxu0 %v211_v7  ;;  %574 = vmatpush3.msra.mxu1 %v211_v7  ;;  %v203_v23 = vld [vmem:[%s959_s1 + $0x20] sm:$0xff]  ;;  %v218_v24 = vld [vmem:[%s959_s1 + $0x98] sm:$0xff]  ;;  %v217_v26 = vld [vmem:[%s959_s1 + $0x90] sm:$0xff] }
  0x38   : > { %483 = vmatprep.subr.mxu0 %v226_v8  ;;  %559 = vmatprep.subr.mxu1 %v226_v8  ;;  %v202_v25 = vld [vmem:[%s959_s1 + $0x18] sm:$0xff]  ;;  %v201_v27 = vld [vmem:[%s959_s1 + $0x10] sm:$0xff]  ;;  %v216_v28 = vld [vmem:[%s959_s1 + $0x88] sm:$0xff] }
  0x39   : > { %484 = vmatpush3.msra.mxu0 %v210_v9  ;;  %575 = vmatpush3.msra.mxu1 %v210_v9  ;;  %v200_v29 = vld [vmem:[%s959_s1 + $0x8] sm:$0xff]  ;;  %v215_v30 = vld [vmem:[%s959_s1 + $0x80] sm:$0xff]  ;;  %v170_v36 = vld [vmem:[%s788_s23 + $0x18] sm:$0xff] }
  0x3a   : > { %485 = vmatprep.subr.mxu0 %v225_v10  ;;  %560 = vmatprep.subr.mxu1 %v225_v10  ;;  %v199_v31 = vld [vmem:[%s959_s1] sm:$0xff]  ;;  %v168_v32 = vld [vmem:[%s788_s23 + $0x8] sm:$0xff]  ;;  %v186_v37 = vld [vmem:[%s788_s23 + $0x98] sm:$0xff] }
  0x3b   : > { %486 = vmatpush3.msra.mxu0 %v209_v11  ;;  %576 = vmatpush3.msra.mxu1 %v209_v11  ;;  %v184_v33 = vld [vmem:[%s788_s23 + $0x88] sm:$0xff]  ;;  %v167_v34 = vld [vmem:[%s788_s23] sm:$0xff]  ;;  %v169_v38 = vld [vmem:[%s788_s23 + $0x10] sm:$0xff] }
  0x3c   : > { %487 = vmatprep.subr.mxu0 %v224_v12  ;;  %561 = vmatprep.subr.mxu1 %v224_v12  ;;  %v183_v35 = vld [vmem:[%s788_s23 + $0x80] sm:$0xff]  ;;  %v185_v39 = vld [vmem:[%s788_s23 + $0x90] sm:$0xff]  ;;  %v172_v40 = vld [vmem:[%s788_s23 + $0x28] sm:$0xff] }
  0x3d   : > { %488 = vmatpush3.msra.mxu0 %v208_v13  ;;  %577 = vmatpush3.msra.mxu1 %v208_v13  ;;  %v188_v41 = vld [vmem:[%s788_s23 + $0xa8] sm:$0xff]  ;;  %v171_v42 = vld [vmem:[%s788_s23 + $0x20] sm:$0xff]  ;;  %v174_v44 = vld [vmem:[%s788_s23 + $0x38] sm:$0xff] }
  0x3e   : > { %489 = vmatprep.subr.mxu0 %v223_v14  ;;  %562 = vmatprep.subr.mxu1 %v223_v14  ;;  %v187_v43 = vld [vmem:[%s788_s23 + $0xa0] sm:$0xff]  ;;  %v190_v45 = vld [vmem:[%s788_s23 + $0xb8] sm:$0xff]  ;;  %v173_v46 = vld [vmem:[%s788_s23 + $0x30] sm:$0xff] }
  0x3f   : > { %490 = vmatpush3.msra.mxu0 %v207_v15  ;;  %578 = vmatpush3.msra.mxu1 %v207_v15  ;;  %v189_v47 = vld [vmem:[%s788_s23 + $0xb0] sm:$0xff]  ;;  %v176_v48 = vld [vmem:[%s788_s23 + $0x48] sm:$0xff]  ;;  %v175_v50 = vld [vmem:[%s788_s23 + $0x40] sm:$0xff] }
  0x40   : > { %491 = vmatprep.subr.mxu0 %v222_v16  ;;  %563 = vmatprep.subr.mxu1 %v222_v16  ;;  %v192_v49 = vld [vmem:[%s788_s23 + $0xc8] sm:$0xff]  ;;  %v191_v51 = vld [vmem:[%s788_s23 + $0xc0] sm:$0xff]  ;;  %v178_v52 = vld [vmem:[%s788_s23 + $0x58] sm:$0xff] }
  0x41   : > { %492 = vmatpush3.msra.mxu0 %v206_v17  ;;  %579 = vmatpush3.msra.mxu1 %v206_v17  ;;  %v194_v53 = vld [vmem:[%s788_s23 + $0xd8] sm:$0xff]  ;;  %v177_v54 = vld [vmem:[%s788_s23 + $0x50] sm:$0xff]  ;;  %v180_v56 = vld [vmem:[%s788_s23 + $0x68] sm:$0xff] }
  0x42   : > { %493 = vmatprep.subr.mxu0 %v221_v18  ;;  %564 = vmatprep.subr.mxu1 %v221_v18  ;;  %v193_v55 = vld [vmem:[%s788_s23 + $0xd0] sm:$0xff]  ;;  %v196_v57 = vld [vmem:[%s788_s23 + $0xe8] sm:$0xff]  ;;  %v179_v58 = vld [vmem:[%s788_s23 + $0x60] sm:$0xff] }
  0x43   : > { %494 = vmatpush3.msra.mxu0 %v205_v19  ;;  %580 = vmatpush3.msra.mxu1 %v205_v19  ;;  %v195_v59 = vld [vmem:[%s788_s23 + $0xe0] sm:$0xff]  ;;  %v182_v60 = vld [vmem:[%s788_s23 + $0x78] sm:$0xff]  ;;  %v181_v62 = vld [vmem:[%s788_s23 + $0x70] sm:$0xff] }
  0x44   : > { %495 = vmatprep.subr.mxu0 %v220_v20  ;;  %565 = vmatprep.subr.mxu1 %v220_v20  ;;  %v198_v61 = vld [vmem:[%s788_s23 + $0xf8] sm:$0xff]  ;;  %v197_v63 = vld [vmem:[%s788_s23 + $0xf0] sm:$0xff] }
  0x45   : > { %496 = vmatpush3.msra.mxu0 %v204_v21  ;;  %581 = vmatpush3.msra.mxu1 %v204_v21 }
  0x46   : > { %497 = vmatprep.subr.mxu0 %v219_v22  ;;  %566 = vmatprep.subr.mxu1 %v219_v22 }
  0x47   : > { %498 = vmatpush3.msra.mxu0 %v203_v23  ;;  %582 = vmatpush3.msra.mxu1 %v203_v23 }
  0x48   : > { %499 = vmatprep.subr.mxu0 %v218_v24  ;;  %567 = vmatprep.subr.mxu1 %v218_v24 }
  0x49   : > { %500 = vmatpush3.msra.mxu0 %v202_v25  ;;  %583 = vmatpush3.msra.mxu1 %v202_v25 }
  0x4a   : > { %501 = vmatprep.subr.mxu0 %v217_v26  ;;  %568 = vmatprep.subr.mxu1 %v217_v26 }
  0x4b   : > { %502 = vmatpush3.msra.mxu0 %v201_v27  ;;  %584 = vmatpush3.msra.mxu1 %v201_v27 }
  0x4c   : > { %503 = vmatprep.subr.mxu0 %v216_v28  ;;  %569 = vmatprep.subr.mxu1 %v216_v28 }
  0x4d   : > { %504 = vmatpush3.msra.mxu0 %v200_v29  ;;  %585 = vmatpush3.msra.mxu1 %v200_v29 }
  0x4e   : > { %505 = vmatprep.subr.mxu0 %v215_v30  ;;  %570 = vmatprep.subr.mxu1 %v215_v30 }
  0x4f   : > { %506 = vmatpush3.msra.mxu0 %v199_v31  ;;  %586 = vmatpush3.msra.mxu1 %v199_v31 }
  0x50   : > { %295 = vmatprep.mubr.f32.mxu0 %v168_v32  ;;  %335 = vmatprep.mubr.f32.mxu1 %v184_v33 }
  0x51   : > { %296 = vmatmul.mubr.f32.vlgmr.msra.gmra.mxu0 %v167_v34  ;;  %336 = vmatmul.mubr.f32.vlgmr.msra.gmra.mxu1 %v183_v35 }
  0x52   : > { %300 = vmatprep.mubr.f32.mxu0 %v170_v36  ;;  %340 = vmatprep.mubr.f32.mxu1 %v186_v37 }
  0x55   : > { %301 = vmatmul.mubr.f32.gmra.mxu0 %v169_v38  ;;  %341 = vmatmul.mubr.f32.gmra.mxu1 %v185_v39 }
  0x56   : > { %305 = vmatprep.mubr.f32.mxu0 %v172_v40  ;;  %345 = vmatprep.mubr.f32.mxu1 %v188_v41 }
  0x59   : > { %306 = vmatmul.mubr.f32.gmra.mxu0 %v171_v42  ;;  %346 = vmatmul.mubr.f32.gmra.mxu1 %v187_v43 }
  0x5a   : > { %310 = vmatprep.mubr.f32.mxu0 %v174_v44  ;;  %350 = vmatprep.mubr.f32.mxu1 %v190_v45 }
  0x5d   : > { %311 = vmatmul.mubr.f32.gmra.mxu0 %v173_v46  ;;  %351 = vmatmul.mubr.f32.gmra.mxu1 %v189_v47 }
  0x5e   : > { %315 = vmatprep.mubr.f32.mxu0 %v176_v48  ;;  %355 = vmatprep.mubr.f32.mxu1 %v192_v49 }
  0x61   : > { %316 = vmatmul.mubr.f32.gmra.mxu0 %v175_v50  ;;  %356 = vmatmul.mubr.f32.gmra.mxu1 %v191_v51 }
  0x62   : > { %320 = vmatprep.mubr.f32.mxu0 %v178_v52  ;;  %360 = vmatprep.mubr.f32.mxu1 %v194_v53 }
  0x65   : > { %321 = vmatmul.mubr.f32.gmra.mxu0 %v177_v54  ;;  %361 = vmatmul.mubr.f32.gmra.mxu1 %v193_v55 }
  0x66   : > { %325 = vmatprep.mubr.f32.mxu0 %v180_v56  ;;  %365 = vmatprep.mubr.f32.mxu1 %v196_v57 }
  0x69   : > { %326 = vmatmul.mubr.f32.gmra.mxu0 %v179_v58  ;;  %366 = vmatmul.mubr.f32.gmra.mxu1 %v195_v59 }
  0x6a   : > { %330 = vmatprep.mubr.f32.mxu0 %v182_v60  ;;  %370 = vmatprep.mubr.f32.mxu1 %v198_v61 }
  0x6d   : > { %331 = vmatmul.mubr.f32.gmra.mxu0 %v181_v62  ;;  %371 = vmatmul.mubr.f32.gmra.mxu1 %v197_v63 }
 0x111   : > { %v507_v0 = vpop.f32.mrf.mxu0  ;;  %v531_v1 = vpop.f32.mrf.mxu1 }
 0x113   : > { %v508_v2 = vpop.f32.mrf.mxu0  ;;  %v532_v3 = vpop.f32.mrf.mxu1 }
 0x114   : > { %v509_v4 = vadd.f32 %v508_v2, %v507_v0  ;;  %v533_v5 = vadd.f32 %v532_v3, %v531_v1 }
 0x115   : > { %v510_v6 = vpop.f32.mrf.mxu0  ;;  %v534_v7 = vpop.f32.mrf.mxu1 }
 0x116   : > { %376 = vst [vmem:[%s927_s28] sm:$0xff] %v509_v4  ;;  %384 = vst [vmem:[%s927_s28 + $0x40] sm:$0xff] %v533_v5 }
 0x117   : > { %v511_v8 = vpop.f32.mrf.mxu0  ;;  %v535_v9 = vpop.f32.mrf.mxu1 }
 0x118   : > { %v512_v10 = vadd.f32 %v511_v8, %v510_v6  ;;  %v536_v11 = vadd.f32 %v535_v9, %v534_v7 }
 0x119   : > { %v513_v12 = vpop.f32.mrf.mxu0  ;;  %v537_v13 = vpop.f32.mrf.mxu1 }
 0x11a   : > { %377 = vst [vmem:[%s927_s28 + $0x8] sm:$0xff] %v512_v10  ;;  %385 = vst [vmem:[%s927_s28 + $0x48] sm:$0xff] %v536_v11 }
 0x11b   : > { %v514_v14 = vpop.f32.mrf.mxu0  ;;  %v538_v15 = vpop.f32.mrf.mxu1 }
 0x11c   : > { %v515_v16 = vadd.f32 %v514_v14, %v513_v12  ;;  %v539_v17 = vadd.f32 %v538_v15, %v537_v13 }
 0x11d   : > { %v516_v18 = vpop.f32.mrf.mxu0  ;;  %v540_v19 = vpop.f32.mrf.mxu1 }
 0x11e   : > { %378 = vst [vmem:[%s927_s28 + $0x10] sm:$0xff] %v515_v16  ;;  %386 = vst [vmem:[%s927_s28 + $0x50] sm:$0xff] %v539_v17 }
 0x11f   : > { %v517_v20 = vpop.f32.mrf.mxu0  ;;  %v541_v21 = vpop.f32.mrf.mxu1 }
 0x120   : > { %v518_v22 = vadd.f32 %v517_v20, %v516_v18  ;;  %v542_v23 = vadd.f32 %v541_v21, %v540_v19 }
 0x121   : > { %v519_v24 = vpop.f32.mrf.mxu0  ;;  %v543_v25 = vpop.f32.mrf.mxu1 }
 0x122   : > { %379 = vst [vmem:[%s927_s28 + $0x18] sm:$0xff] %v518_v22  ;;  %387 = vst [vmem:[%s927_s28 + $0x58] sm:$0xff] %v542_v23 }
 0x123   : > { %v520_v26 = vpop.f32.mrf.mxu0  ;;  %v544_v27 = vpop.f32.mrf.mxu1 }
 0x124   : > { %v521_v28 = vadd.f32 %v520_v26, %v519_v24  ;;  %v545_v29 = vadd.f32 %v544_v27, %v543_v25 }
 0x125   : > { %v522_v30 = vpop.f32.mrf.mxu0  ;;  %v546_v31 = vpop.f32.mrf.mxu1 }
 0x126   : > { %380 = vst [vmem:[%s927_s28 + $0x20] sm:$0xff] %v521_v28  ;;  %388 = vst [vmem:[%s927_s28 + $0x60] sm:$0xff] %v545_v29 }
 0x127   : > { %v523_v32 = vpop.f32.mrf.mxu0  ;;  %v547_v33 = vpop.f32.mrf.mxu1 }
 0x128   : > { %v524_v34 = vadd.f32 %v523_v32, %v522_v30  ;;  %v548_v35 = vadd.f32 %v547_v33, %v546_v31 }
 0x129   : > { %v525_v36 = vpop.f32.mrf.mxu0  ;;  %v549_v37 = vpop.f32.mrf.mxu1 }
 0x12a   : > { %381 = vst [vmem:[%s927_s28 + $0x28] sm:$0xff] %v524_v34  ;;  %389 = vst [vmem:[%s927_s28 + $0x68] sm:$0xff] %v548_v35 }
 0x12b   : > { %v526_v38 = vpop.f32.mrf.mxu0  ;;  %v550_v39 = vpop.f32.mrf.mxu1 }
 0x12c   : > { %v527_v40 = vadd.f32 %v526_v38, %v525_v36  ;;  %v551_v41 = vadd.f32 %v550_v39, %v549_v37 }
 0x12d   : > { %v528_v42 = vpop.f32.mrf.mxu0  ;;  %v552_v43 = vpop.f32.mrf.mxu1 }
 0x12e   : > { %382 = vst [vmem:[%s927_s28 + $0x30] sm:$0xff] %v527_v40  ;;  %390 = vst [vmem:[%s927_s28 + $0x70] sm:$0xff] %v551_v41 }
 0x12f   : > { %v529_v44 = vpop.f32.mrf.mxu0  ;;  %v553_v45 = vpop.f32.mrf.mxu1 }
 0x130   : > { %v530_v46 = vadd.f32 %v529_v44, %v528_v42  ;;  %v554_v47 = vadd.f32 %v553_v45, %v552_v43 }
 0x132   : > { %383 = vst [vmem:[%s927_s28 + $0x38] sm:$0xff] %v530_v46  ;;  %391 = vst [vmem:[%s927_s28 + $0x78] sm:$0xff] %v554_v47 }
 0x133 PF: > { %p12_p9 = scmp.ge.s32.totalorder %s730_s14, 4   ;;  %s966_s9 = smov %s682_s10 }
 0x134   : > { %s967_s10 = smov %s686_s11  ;;  %s968_s11 = smov %s740_s17 }
 0x135   : > { %s969_s12 = smov %s730_s14  ;;  %14 = sbr.rel (!%p12_p9) target bundleno = 3 (0x3), region = 68 }
 0x13a   :  { %414 = vsyncpa [#allocation3], 1 }
 0x13b   :  { %416 = vsyncpa [#allocation3 + $0x1], 1 }

// kernel: llama_sparse_moe_block.3
= control target key start
LH: loop header
LB: loop body
LE: loop exit
PB: predicated region body
PF: predicated region fallthrough
CT: control target
= control target key end

     0   :  { %s3688_s0 = inlined_call_operand.vmem [shape: s32[12], index: 0, kind: input, shape index: {}]   ;;  %s3689_s2 = inlined_call_operand.vmem [shape: bf16[1536,256], index: 2, kind: input, shape index: {}]   ;;  %s3690_s3 = inlined_call_operand.vmem [shape: f32[1536,1], index: 3, kind: input, shape index: {}]   ;;  %s3691_s4 = inlined_call_operand.vmem [shape: bf16[8,256,1024], index: 4, kind: input, shape index: {}]   ;;  %s3692_s5 = inlined_call_operand.vmem [shape: bf16[8,512,256], index: 5, kind: input, shape index: {}]   ;;  %s3693_s6 = inlined_call_operand.vmem [shape: bf16[1536,256], index: 6, kind: output, shape index: {}]   ;;  %s3694_s1 = inlined_call_operand.vmem [shape: s32[12], index: 1, kind: input, shape index: {}]  }
   0x1   :  { %3695 = sst [smem:[#allocation8_spill]] %s3689_s2  ;;  %s11_s23 = sshll.u32 %s3688_s0, 4  ;;  %s12_s23 = int_to_ptr.vmem [resolvable:$true] %s11_s23 }
   0x2   :  { %3696 = sst [smem:[#allocation9_spill]] %s3690_s3  ;;  %s15_s26 = sshll.u32 %s3694_s1, 4  ;;  %s16_s26 = int_to_ptr.vmem [resolvable:$true] %s15_s26 }
   0x3   :  { %s2921_s27 = scalar_lea.vmem %s12_s23, 16  ;;  %p2926_p1 = scmp.lt.s32.totalorder %s12_s23, %s12_s23 }
   0x4   :  { %p2922_p0 = scmp.ne.s32.totalorder %s12_s23, %s2921_s27  ;;  %p2927_p2 = scmp.lt.s32.totalorder %s2921_s27, %s2921_s27 }
   0x6   :  { %p2928_p3 = por %p2927_p2, %p2926_p1 }
   0x8   :  { %p2929_p4 = pnand %p2928_p3, %p2922_p0 }
   0xa   :  { %2932 = shalt.err (!%p2929_p4)  }
   0xb   :  { %s3003_s28 = smov [#allocation4]   ;;  %s2933_s29 = scalar_lea.vmem %s16_s26, 16 }
   0xc   :  { %14 = dma.vmem_to_smem %s12_s23, 16, %s3003_s28, [#allocation3] }
   0xd   :  { %p2934_p5 = scmp.ne.s32.totalorder %s16_s26, %s2933_s29  ;;  %p2938_p6 = scmp.lt.s32.totalorder %s16_s26, %s16_s26 }
   0xe   :  { %p2939_p7 = scmp.lt.s32.totalorder %s2933_s29, %s2933_s29 }
  0x10   :  { %p2940_p8 = por %p2939_p7, %p2938_p6 }
  0x12   :  { %p2941_p9 = pnand %p2940_p8, %p2934_p5 }
  0x14   :  { %2944 = shalt.err (!%p2941_p9)  }
  0x15   :  { %s3004_s0 = smov [#allocation5]  }
  0x16   :  { %18 = dma.vmem_to_smem %s16_s26, 16, %s3004_s0, [#allocation3] }
  0x17   :  { %2973 = dma.done.wait [#allocation3], 32 }
  0x18   :  { %2974 = vsyncadd [#allocation3], 4294967264 }
  0x19   :  { %20 = sfence }
  0x1a   :  { %s3048_s1 = smov 0   ;;  %s3050_s30 = smov 0  }
  0x1b   :  { %s3052_s7 = smov 0   ;;  %s3054_s8 = smov 0  }
  0x1c   :  { %s3056_s9 = smov 0   ;;  %s3058_s10 = smov 0  }
  0x1d   :  { %s3060_s11 = smov 0  }
  0x1e LB: > { %s35_s12 = sadd.s32 1, %s2993_s9  ;;  %s38_s13 = sadd.s32 1, %s2997_s10  ;;  %s3001_s11 = sphi %s3060_s11, %s26_s11   ;;  %s2997_s10 = sphi %s3058_s10, %s3705_s10   ;;  %s2993_s9 = sphi %s3056_s9, %s3704_s9   ;;  %s2989_s8 = sphi %s3054_s8, %s3703_s8   ;;  %s2985_s7 = sphi %s3052_s7, %s3702_s7   ;;  %s2981_s30 = sphi %s3050_s30, %s3701_s30   ;;  %s2977_s1 = sphi %s3048_s1, %s3700_s1  }
  0x1f   : > { %p36_p10 = scmp.ge.s32.totalorder %s35_s12, 2  ;;  %s95_s14 = sld [smem:[#allocation5 + %s2997_s10]] }
  0x20   : > { %p114_p11 = scmp.ne.s32.totalorder %s2981_s30, %s2977_s1  ;;  %p115_p12 = scmp.eq.s32.totalorder %s3001_s11, 0 }
  0x21   : > { %s3707_s13 = smov (!%p36_p10, %s38_s13), %s2997_s10  ;;  %s94_s16 = sld [smem:[#allocation4 + %s2997_s10]] }
  0x22   : > { %p40_p13 = scmp.ge.s32.totalorder %s3707_s13, 12  ;;  %p3090_p0 = por %p115_p12, %p114_p11 }
  0x23   : > { %s3711_s12 = smov (%p36_p10, %s35_s12), 0  ;;  %s107_s24 = sadd.s32 1, %s2981_s30 }
  0x24   : > { %s3709_s13 = smov (%p40_p13, %s3707_s13), 0  ;;  %p2329_p4 = scmp.ge.s32.totalorder %s3001_s11, 24 }
  0x25   : > { %s98_s17 = sld [smem:[#allocation4 + %s3709_s13]]  ;;  %p96_p1 = scmp.ne.s32.totalorder %s95_s14, 0 }
  0x26   : > { %s99_s18 = sld [smem:[#allocation5 + %s3709_s13]] }
  0x27   : > { %s97_s19 = scalar_select %p96_p1, %s2993_s9, 1 }
  0x2b   : > { %s102_s20 = ssub.s32 %s94_s16, %s98_s17 }
  0x2c   : > { %p100_p2 = scmp.ne.s32.totalorder %s99_s18, 0 }
  0x2e   : > { %s101_s21 = scalar_select %p100_p2, %s3711_s12, 1 }
  0x30   : > { %s103_s22 = ssub.s32 %s97_s19, %s101_s21  ;;  %202 = sbr.rel (%p2329_p4) target bundleno = 101 (0x65), region = 16 }
  0x31   : > { %s104_s23 = sor.u32 %s103_s22, %s102_s20 }
  0x32   : > { %p105_p3 = scmp.eq.s32.totalorder %s104_s23, 0 }
  0x34   : > { %s3105_s25 = scalar_select %p105_p3, %s2981_s30, %s107_s24  }
  0x35   : > { %224 = sbr.rel (!%p3090_p0) target bundleno = 101 (0x65), region = 28  ;;  %s229_s26 = sld [smem:[#allocation4 + %s2997_s10]] (%p3090_p0) }
  0x36   : > { %s230_s27 = sld [smem:[#allocation5 + %s2997_s10]] (%p3090_p0)  ;;  %s226_s28 = sand.u32 (%p3090_p0), 1, %s2981_s30  }
  0x37   : > { %s2330_s14 = sshll.u32 (%p3090_p0), %s226_s28, 9 }
  0x38   : > { %s3122_s15 = scalar_lea.vmem (%p3090_p0), [#allocation6], %s2330_s14 }
  0x3b   : > { %s2332_s29 = sshll.u32 %s229_s26, 8 }
  0x3c   : > { %p231_p5 = scmp.ne.s32.totalorder %s230_s27, 0 }
  0x3e   : > { %s232_s0 = scalar_select %p231_p5, %s2993_s9, 1 }
  0x40   : > { %s2331_s16 = sshll.u32 %s232_s0, 2 }
  0x41   : > { %s235_s17 = sadd.s32 %s2332_s29, %s2331_s16 }
  0x42   : > { %s2333_s18 = sshll.u32 %s235_s17, 2 }
  0x43   : > { %s3117_s21 = scalar_lea.vmem %s3691_s4, %s2333_s18 }
  0x44   : > { %v250_v0 = vld [vmem:[%s3117_s21] sm:$0xff]  ;;  %v252_v1 = vld [vmem:[%s3117_s21 + $0x8] sm:$0xff] }
  0x45   : > { %v254_v2 = vld [vmem:[%s3117_s21 + $0x20] sm:$0xff]  ;;  %251 = vst [vmem:[%s3122_s15] sm:$0xff] %v250_v0  ;;  %253 = vst [vmem:[%s3122_s15 + $0x8] sm:$0xff] %v252_v1  ;;  %v256_v3 = vld [vmem:[%s3117_s21 + $0x28] sm:$0xff] }
  0x46   : > { %255 = vst [vmem:[%s3122_s15 + $0x10] sm:$0xff] %v254_v2  ;;  %v258_v4 = vld [vmem:[%s3117_s21 + $0x40] sm:$0xff]  ;;  %v260_v5 = vld [vmem:[%s3117_s21 + $0x48] sm:$0xff]  ;;  %257 = vst [vmem:[%s3122_s15 + $0x18] sm:$0xff] %v256_v3 }
  0x47   : > { %259 = vst [vmem:[%s3122_s15 + $0x20] sm:$0xff] %v258_v4  ;;  %261 = vst [vmem:[%s3122_s15 + $0x28] sm:$0xff] %v260_v5  ;;  %v262_v6 = vld [vmem:[%s3117_s21 + $0x60] sm:$0xff]  ;;  %v264_v7 = vld [vmem:[%s3117_s21 + $0x68] sm:$0xff] }
  0x48   : > { %v266_v8 = vld [vmem:[%s3117_s21 + $0x80] sm:$0xff]  ;;  %263 = vst [vmem:[%s3122_s15 + $0x30] sm:$0xff] %v262_v6  ;;  %265 = vst [vmem:[%s3122_s15 + $0x38] sm:$0xff] %v264_v7  ;;  %v268_v9 = vld [vmem:[%s3117_s21 + $0x88] sm:$0xff] }
  0x49   : > { %267 = vst [vmem:[%s3122_s15 + $0x40] sm:$0xff] %v266_v8  ;;  %v270_v10 = vld [vmem:[%s3117_s21 + $0xa0] sm:$0xff]  ;;  %v272_v11 = vld [vmem:[%s3117_s21 + $0xa8] sm:$0xff]  ;;  %269 = vst [vmem:[%s3122_s15 + $0x48] sm:$0xff] %v268_v9 }
  0x4a   : > { %271 = vst [vmem:[%s3122_s15 + $0x50] sm:$0xff] %v270_v10  ;;  %273 = vst [vmem:[%s3122_s15 + $0x58] sm:$0xff] %v272_v11  ;;  %v274_v12 = vld [vmem:[%s3117_s21 + $0xc0] sm:$0xff]  ;;  %v276_v13 = vld [vmem:[%s3117_s21 + $0xc8] sm:$0xff] }
  0x4b   : > { %v278_v14 = vld [vmem:[%s3117_s21 + $0xe0] sm:$0xff]  ;;  %275 = vst [vmem:[%s3122_s15 + $0x60] sm:$0xff] %v274_v12  ;;  %277 = vst [vmem:[%s3122_s15 + $0x68] sm:$0xff] %v276_v13  ;;  %v280_v15 = vld [vmem:[%s3117_s21 + $0xe8] sm:$0xff] }
  0x4c   : > { %279 = vst [vmem:[%s3122_s15 + $0x70] sm:$0xff] %v278_v14  ;;  %v282_v16 = vld [vmem:[%s3117_s21 + $0x100] sm:$0xff]  ;;  %v284_v17 = vld [vmem:[%s3117_s21 + $0x108] sm:$0xff]  ;;  %281 = vst [vmem:[%s3122_s15 + $0x78] sm:$0xff] %v280_v15 }
  0x4d   : > { %283 = vst [vmem:[%s3122_s15 + $0x80] sm:$0xff] %v282_v16  ;;  %285 = vst [vmem:[%s3122_s15 + $0x88] sm:$0xff] %v284_v17  ;;  %v286_v18 = vld [vmem:[%s3117_s21 + $0x120] sm:$0xff]  ;;  %v288_v19 = vld [vmem:[%s3117_s21 + $0x128] sm:$0xff] }
  0x4e   : > { %v290_v20 = vld [vmem:[%s3117_s21 + $0x140] sm:$0xff]  ;;  %287 = vst [vmem:[%s3122_s15 + $0x90] sm:$0xff] %v286_v18  ;;  %289 = vst [vmem:[%s3122_s15 + $0x98] sm:$0xff] %v288_v19  ;;  %v292_v21 = vld [vmem:[%s3117_s21 + $0x148] sm:$0xff] }
  0x4f   : > { %291 = vst [vmem:[%s3122_s15 + $0xa0] sm:$0xff] %v290_v20  ;;  %v294_v22 = vld [vmem:[%s3117_s21 + $0x160] sm:$0xff]  ;;  %v296_v23 = vld [vmem:[%s3117_s21 + $0x168] sm:$0xff]  ;;  %293 = vst [vmem:[%s3122_s15 + $0xa8] sm:$0xff] %v292_v21 }
  0x50   : > { %295 = vst [vmem:[%s3122_s15 + $0xb0] sm:$0xff] %v294_v22  ;;  %297 = vst [vmem:[%s3122_s15 + $0xb8] sm:$0xff] %v296_v23  ;;  %v298_v24 = vld [vmem:[%s3117_s21 + $0x180] sm:$0xff]  ;;  %v300_v25 = vld [vmem:[%s3117_s21 + $0x188] sm:$0xff] }
  0x51   : > { %v302_v26 = vld [vmem:[%s3117_s21 + $0x1a0] sm:$0xff]  ;;  %299 = vst [vmem:[%s3122_s15 + $0xc0] sm:$0xff] %v298_v24  ;;  %301 = vst [vmem:[%s3122_s15 + $0xc8] sm:$0xff] %v300_v25  ;;  %v304_v27 = vld [vmem:[%s3117_s21 + $0x1a8] sm:$0xff] }
  0x52   : > { %303 = vst [vmem:[%s3122_s15 + $0xd0] sm:$0xff] %v302_v26  ;;  %v306_v28 = vld [vmem:[%s3117_s21 + $0x1c0] sm:$0xff]  ;;  %v308_v29 = vld [vmem:[%s3117_s21 + $0x1c8] sm:$0xff]  ;;  %305 = vst [vmem:[%s3122_s15 + $0xd8] sm:$0xff] %v304_v27 }
  0x53   : > { %307 = vst [vmem:[%s3122_s15 + $0xe0] sm:$0xff] %v306_v28  ;;  %309 = vst [vmem:[%s3122_s15 + $0xe8] sm:$0xff] %v308_v29  ;;  %v310_v30 = vld [vmem:[%s3117_s21 + $0x1e0] sm:$0xff]  ;;  %v312_v31 = vld [vmem:[%s3117_s21 + $0x1e8] sm:$0xff] }
  0x54   : > { %v314_v32 = vld [vmem:[%s3117_s21 + $0x200] sm:$0xff]  ;;  %311 = vst [vmem:[%s3122_s15 + $0xf0] sm:$0xff] %v310_v30  ;;  %313 = vst [vmem:[%s3122_s15 + $0xf8] sm:$0xff] %v312_v31  ;;  %v316_v33 = vld [vmem:[%s3117_s21 + $0x208] sm:$0xff] }
  0x55   : > { %315 = vst [vmem:[%s3122_s15 + $0x100] sm:$0xff] %v314_v32  ;;  %v318_v34 = vld [vmem:[%s3117_s21 + $0x220] sm:$0xff]  ;;  %v320_v35 = vld [vmem:[%s3117_s21 + $0x228] sm:$0xff]  ;;  %317 = vst [vmem:[%s3122_s15 + $0x108] sm:$0xff] %v316_v33 }
  0x56   : > { %319 = vst [vmem:[%s3122_s15 + $0x110] sm:$0xff] %v318_v34  ;;  %321 = vst [vmem:[%s3122_s15 + $0x118] sm:$0xff] %v320_v35  ;;  %v322_v36 = vld [vmem:[%s3117_s21 + $0x240] sm:$0xff]  ;;  %v324_v37 = vld [vmem:[%s3117_s21 + $0x248] sm:$0xff] }
  0x57   : > { %v326_v38 = vld [vmem:[%s3117_s21 + $0x260] sm:$0xff]  ;;  %323 = vst [vmem:[%s3122_s15 + $0x120] sm:$0xff] %v322_v36  ;;  %325 = vst [vmem:[%s3122_s15 + $0x128] sm:$0xff] %v324_v37  ;;  %v328_v39 = vld [vmem:[%s3117_s21 + $0x268] sm:$0xff] }
  0x58   : > { %327 = vst [vmem:[%s3122_s15 + $0x130] sm:$0xff] %v326_v38  ;;  %v330_v40 = vld [vmem:[%s3117_s21 + $0x280] sm:$0xff]  ;;  %v332_v41 = vld [vmem:[%s3117_s21 + $0x288] sm:$0xff]  ;;  %329 = vst [vmem:[%s3122_s15 + $0x138] sm:$0xff] %v328_v39 }
  0x59   : > { %331 = vst [vmem:[%s3122_s15 + $0x140] sm:$0xff] %v330_v40  ;;  %333 = vst [vmem:[%s3122_s15 + $0x148] sm:$0xff] %v332_v41  ;;  %v334_v42 = vld [vmem:[%s3117_s21 + $0x2a0] sm:$0xff]  ;;  %v336_v43 = vld [vmem:[%s3117_s21 + $0x2a8] sm:$0xff] }
  0x5a   : > { %v338_v44 = vld [vmem:[%s3117_s21 + $0x2c0] sm:$0xff]  ;;  %335 = vst [vmem:[%s3122_s15 + $0x150] sm:$0xff] %v334_v42  ;;  %337 = vst [vmem:[%s3122_s15 + $0x158] sm:$0xff] %v336_v43  ;;  %v340_v45 = vld [vmem:[%s3117_s21 + $0x2c8] sm:$0xff] }
  0x5b   : > { %339 = vst [vmem:[%s3122_s15 + $0x160] sm:$0xff] %v338_v44  ;;  %v342_v46 = vld [vmem:[%s3117_s21 + $0x2e0] sm:$0xff]  ;;  %v344_v47 = vld [vmem:[%s3117_s21 + $0x2e8] sm:$0xff]  ;;  %341 = vst [vmem:[%s3122_s15 + $0x168] sm:$0xff] %v340_v45 }
  0x5c   : > { %343 = vst [vmem:[%s3122_s15 + $0x170] sm:$0xff] %v342_v46  ;;  %345 = vst [vmem:[%s3122_s15 + $0x178] sm:$0xff] %v344_v47  ;;  %v346_v48 = vld [vmem:[%s3117_s21 + $0x300] sm:$0xff]  ;;  %v348_v49 = vld [vmem:[%s3117_s21 + $0x308] sm:$0xff] }
  0x5d   : > { %v350_v50 = vld [vmem:[%s3117_s21 + $0x320] sm:$0xff]  ;;  %347 = vst [vmem:[%s3122_s15 + $0x180] sm:$0xff] %v346_v48  ;;  %349 = vst [vmem:[%s3122_s15 + $0x188] sm:$0xff] %v348_v49  ;;  %v352_v51 = vld [vmem:[%s3117_s21 + $0x328] sm:$0xff] }
  0x5e   : > { %351 = vst [vmem:[%s3122_s15 + $0x190] sm:$0xff] %v350_v50  ;;  %v354_v52 = vld [vmem:[%s3117_s21 + $0x340] sm:$0xff]  ;;  %v356_v53 = vld [vmem:[%s3117_s21 + $0x348] sm:$0xff]  ;;  %353 = vst [vmem:[%s3122_s15 + $0x198] sm:$0xff] %v352_v51 }
  0x5f   : > { %355 = vst [vmem:[%s3122_s15 + $0x1a0] sm:$0xff] %v354_v52  ;;  %357 = vst [vmem:[%s3122_s15 + $0x1a8] sm:$0xff] %v356_v53  ;;  %v358_v54 = vld [vmem:[%s3117_s21 + $0x360] sm:$0xff]  ;;  %v360_v55 = vld [vmem:[%s3117_s21 + $0x368] sm:$0xff] }
  0x60   : > { %v362_v56 = vld [vmem:[%s3117_s21 + $0x380] sm:$0xff]  ;;  %359 = vst [vmem:[%s3122_s15 + $0x1b0] sm:$0xff] %v358_v54  ;;  %361 = vst [vmem:[%s3122_s15 + $0x1b8] sm:$0xff] %v360_v55  ;;  %v364_v57 = vld [vmem:[%s3117_s21 + $0x388] sm:$0xff] }
  0x61   : > { %363 = vst [vmem:[%s3122_s15 + $0x1c0] sm:$0xff] %v362_v56  ;;  %v366_v58 = vld [vmem:[%s3117_s21 + $0x3a0] sm:$0xff]  ;;  %v368_v59 = vld [vmem:[%s3117_s21 + $0x3a8] sm:$0xff]  ;;  %365 = vst [vmem:[%s3122_s15 + $0x1c8] sm:$0xff] %v364_v57 }
  0x62   : > { %367 = vst [vmem:[%s3122_s15 + $0x1d0] sm:$0xff] %v366_v58  ;;  %369 = vst [vmem:[%s3122_s15 + $0x1d8] sm:$0xff] %v368_v59  ;;  %v370_v60 = vld [vmem:[%s3117_s21 + $0x3c0] sm:$0xff]  ;;  %v372_v61 = vld [vmem:[%s3117_s21 + $0x3c8] sm:$0xff] }
  0x63   : > { %v374_v62 = vld [vmem:[%s3117_s21 + $0x3e0] sm:$0xff]  ;;  %371 = vst [vmem:[%s3122_s15 + $0x1e0] sm:$0xff] %v370_v60  ;;  %373 = vst [vmem:[%s3122_s15 + $0x1e8] sm:$0xff] %v372_v61  ;;  %v376_v63 = vld [vmem:[%s3117_s21 + $0x3e8] sm:$0xff] }
  0x64   : > { %375 = vst [vmem:[%s3122_s15 + $0x1f0] sm:$0xff] %v374_v62  ;;  %377 = vst [vmem:[%s3122_s15 + $0x1f8] sm:$0xff] %v376_v63 }
  0x65 PF: > { %p2334_p6 = scmp.ge.s32.totalorder %s3001_s11, 1  ;;  %p404_p7 = scmp.lt.s32.totalorder %s3001_s11, 25 }
  0x67   : > { %p405_p8 = pnand %p2334_p6, %p404_p7 }
  0x68   : > { %s411_s22 = sand.u32 (!%p405_p8), 1, %s2977_s1   ;;  %s2336_s23 = sshll.u32 (!%p405_p8), %s2989_s8, 4 }
  0x69   : > { %408 = sbr.rel (%p405_p8) target bundleno = 740 (0x2e4), region = 55  ;;  %s2335_s24 = sshll.u32 (!%p405_p8), %s411_s22, 9 }
  0x6a   : > { %p463_p9 = scmp.lt.s32.totalorder (!%p405_p8), %s2336_s23, 191  ;;  %s480_s26 = sld [smem:[#allocation4 + %s2989_s8]] (!%p405_p8) }
  0x6b   : > { %s481_s27 = sld [smem:[#allocation5 + %s2989_s8]] (!%p405_p8)  ;;  %p2348_p13 = scmp.ne.s32.totalorder (!%p405_p8), %s2985_s7, 0 }
  0x6c   : > { %s3256_s29 = sld [smem:[#allocation5 + %s2989_s8]] (!%p405_p8) }
  0x6d   : > { %s3698_s2 = sld [smem:[#allocation8_spill]] (!%p405_p8) }
  0x6e   : > { %s3713_s23 = smov (!%p463_p9, %s2336_s23), 191  ;;  %s3699_s3 = sld [smem:[#allocation9_spill]] }
  0x6f   : > { %s2513_s28 = sshll.u32 %s3713_s23, 3 }
  0x70   : > { %s3271_s21 = scalar_lea.vmem %s3693_s6, %s2513_s28  ;;  %p485_p10 = scmp.lt.s32.totalorder %s480_s26, 7 }
  0x71   : > { %p482_p11 = scmp.ne.s32.totalorder %s481_s27, 0 }
  0x72   : > { %s3715_s26 = smov (!%p485_p10, %s480_s26), 7 }
  0x73   : > { %s3261_s16 = scalar_lea.vmem %s3698_s2, %s2513_s28  ;;  %s2343_s22 = sshll.u32 %s3715_s26, 7 }
  0x74   : > { %s3266_s19 = scalar_lea.vmem %s3699_s3, %s2513_s28  ;;  %s3279_s3 = scalar_lea.vmem [#allocation6], %s2335_s24 }
  0x75   : > { %s483_s8 = scalar_select %p482_p11, %s2985_s7, 1 }
  0x77   : > { %s2341_s15 = sshll.u32 %s483_s8, 5 }
  0x78   : > { %p487_p12 = scmp.lt.s32.totalorder %s2341_s15, 63 }
  0x7a   : > { %s3717_s15 = smov (!%p487_p12, %s2341_s15), 63  ;;  %511 = sbr.rel (%p2348_p13) target bundleno = 144 (0x90), region = 63 }
  0x7b   : > { %s2342_s23 = sshll.u32 %s3717_s15, 1 }
  0x7c   : > { %s491_s0 = sadd.s32 %s2343_s22, %s2342_s23 }
  0x7d   : > { %s2344_s14 = sshll.u32 %s491_s0, 2 }
  0x7e   : > { %s3277_s18 = scalar_lea.vmem %s3692_s5, %s2344_s14 }
  0x7f   : > { %v3005_v0 = vmov 0.0  }
  0x80   : > { %512 = vst [vmem:[#allocation2 + $0xb0] sm:$0xff] %v3005_v0  ;;  %513 = vst [vmem:[#allocation2] sm:$0xff] %v3005_v0 }
  0x81   : > { %514 = vst [vmem:[#allocation2 + $0xd8] sm:$0xff] %v3005_v0  ;;  %515 = vst [vmem:[#allocation2 + $0x18] sm:$0xff] %v3005_v0 }
  0x82   : > { %516 = vst [vmem:[#allocation2 + $0x50] sm:$0xff] %v3005_v0  ;;  %517 = vst [vmem:[#allocation2 + $0x68] sm:$0xff] %v3005_v0 }
  0x83   : > { %518 = vst [vmem:[#allocation2 + $0x30] sm:$0xff] %v3005_v0  ;;  %519 = vst [vmem:[#allocation2 + $0x48] sm:$0xff] %v3005_v0 }
  0x84   : > { %520 = vst [vmem:[#allocation2 + $0x80] sm:$0xff] %v3005_v0  ;;  %521 = vst [vmem:[#allocation2 + $0x88] sm:$0xff] %v3005_v0 }
  0x85   : > { %522 = vst [vmem:[#allocation2 + $0xe8] sm:$0xff] %v3005_v0  ;;  %523 = vst [vmem:[#allocation2 + $0xb8] sm:$0xff] %v3005_v0 }
  0x86   : > { %524 = vst [vmem:[#allocation2 + $0x60] sm:$0xff] %v3005_v0  ;;  %525 = vst [vmem:[#allocation2 + $0xf0] sm:$0xff] %v3005_v0 }
  0x87   : > { %526 = vst [vmem:[#allocation2 + $0x8] sm:$0xff] %v3005_v0  ;;  %527 = vst [vmem:[#allocation2 + $0x78] sm:$0xff] %v3005_v0 }
  0x88   : > { %528 = vst [vmem:[#allocation2 + $0x38] sm:$0xff] %v3005_v0  ;;  %529 = vst [vmem:[#allocation2 + $0x58] sm:$0xff] %v3005_v0 }
  0x89   : > { %530 = vst [vmem:[#allocation2 + $0x40] sm:$0xff] %v3005_v0  ;;  %531 = vst [vmem:[#allocation2 + $0xc8] sm:$0xff] %v3005_v0 }
  0x8a   : > { %532 = vst [vmem:[#allocation2 + $0xe0] sm:$0xff] %v3005_v0  ;;  %533 = vst [vmem:[#allocation2 + $0x90] sm:$0xff] %v3005_v0 }
  0x8b   : > { %534 = vst [vmem:[#allocation2 + $0x70] sm:$0xff] %v3005_v0  ;;  %535 = vst [vmem:[#allocation2 + $0xc0] sm:$0xff] %v3005_v0 }
  0x8c   : > { %536 = vst [vmem:[#allocation2 + $0xa8] sm:$0xff] %v3005_v0  ;;  %537 = vst [vmem:[#allocation2 + $0xd0] sm:$0xff] %v3005_v0 }
  0x8d   : > { %538 = vst [vmem:[#allocation2 + $0x10] sm:$0xff] %v3005_v0  ;;  %539 = vst [vmem:[#allocation2 + $0x28] sm:$0xff] %v3005_v0 }
  0x8e   : > { %540 = vst [vmem:[#allocation2 + $0xa0] sm:$0xff] %v3005_v0  ;;  %541 = vst [vmem:[#allocation2 + $0xf8] sm:$0xff] %v3005_v0 }
  0x8f   : > { %542 = vst [vmem:[#allocation2 + $0x20] sm:$0xff] %v3005_v0  ;;  %543 = vst [vmem:[#allocation2 + $0x98] sm:$0xff] %v3005_v0 }
  0x90 PF: > { %p2349_p0 = scmp.eq.s32.totalorder %s3256_s29, 0 }
  0x92   : > { %546 = sbr.rel (%p2349_p0) target bundleno = 718 (0x2ce), region = 67 }
  0x97   : > { %v2625_v1 = vld [vmem:[%s3279_s3 + $0xe4] ss:$16 sps:$4 sm:$0xff]   ;;  %v2627_v2 = vld [vmem:[%s3279_s3 + $0xe0] ss:$16 sps:$4 sm:$0xff]   ;;  %v3006_v6 = vmov 0   ;;  %v1510_v60 = vld [vmem:[%s3266_s19 + $0x8] sm:$0xff] }
  0x98   : > { %1027 = vmatprep.subr.bf16.mxu0 %v2625_v1  ;;  %v2628_v3 = vld [vmem:[%s3279_s3 + $0xc4] ss:$16 sps:$4 sm:$0xff]   ;;  %v2630_v4 = vld [vmem:[%s3279_s3 + $0xc0] ss:$16 sps:$4 sm:$0xff]   ;;  %2623 = vset.pattern.permute.xlu0 %v3006_v6  ;;  %v2648_v10 = vld [vmem:[%s3279_s3 + $0xec] ss:$16 sps:$4 sm:$0xff]  }
  0x99   : > { %1028 = vmatpush1.bf16.msra.mxu0 %v2627_v2  ;;  %v2631_v5 = vld [vmem:[%s3279_s3 + $0xa4] ss:$16 sps:$4 sm:$0xff]   ;;  %2624 = vset.pattern.permute.xlu1 %v3006_v6  ;;  %v2633_v7 = vld [vmem:[%s3279_s3 + $0xa0] ss:$16 sps:$4 sm:$0xff]   ;;  %v2651_v11 = vld [vmem:[%s3279_s3 + $0xe8] ss:$16 sps:$4 sm:$0xff]  }
  0x9a   : > { %1029 = vmatprep.subr.bf16.mxu0 %v2628_v3  ;;  %v2634_v8 = vld [vmem:[%s3279_s3 + $0x84] ss:$16 sps:$4 sm:$0xff]   ;;  %v2636_v9 = vld [vmem:[%s3279_s3 + $0x80] ss:$16 sps:$4 sm:$0xff]   ;;  %1140 = vmatprep.subr.bf16.mxu1 %v2648_v10  ;;  %v2654_v13 = vld [vmem:[%s3279_s3 + $0xcc] ss:$16 sps:$4 sm:$0xff]  }
  0x9b   : > { %v2637_v12 = vld [vmem:[%s3279_s3 + $0x64] ss:$16 sps:$4 sm:$0xff]   ;;  %1141 = vmatpush1.bf16.msra.mxu1 %v2651_v11  ;;  %v2657_v14 = vld [vmem:[%s3279_s3 + $0xc8] ss:$16 sps:$4 sm:$0xff]   ;;  %v2639_v15 = vld [vmem:[%s3279_s3 + $0x60] ss:$16 sps:$4 sm:$0xff]  }
  0x9c   : > { %1142 = vmatprep.subr.bf16.mxu1 %v2654_v13  ;;  %v2640_v16 = vld [vmem:[%s3279_s3 + $0x44] ss:$16 sps:$4 sm:$0xff]   ;;  %v2660_v17 = vld [vmem:[%s3279_s3 + $0xac] ss:$16 sps:$4 sm:$0xff]   ;;  %v2663_v18 = vld [vmem:[%s3279_s3 + $0xa8] ss:$16 sps:$4 sm:$0xff]  }
  0x9d   : > { %1030 = vmatpush1.bf16.msra.mxu0 %v2630_v4  ;;  %v2642_v19 = vld [vmem:[%s3279_s3 + $0x40] ss:$16 sps:$4 sm:$0xff]   ;;  %v2666_v20 = vld [vmem:[%s3279_s3 + $0x8c] ss:$16 sps:$4 sm:$0xff]   ;;  %v2643_v21 = vld [vmem:[%s3279_s3 + $0x24] ss:$16 sps:$4 sm:$0xff]  }
  0x9e   : > { %1031 = vmatprep.subr.bf16.mxu0 %v2631_v5  ;;  %v2645_v22 = vld [vmem:[%s3279_s3 + $0x20] ss:$16 sps:$4 sm:$0xff]   ;;  %v2669_v23 = vld [vmem:[%s3279_s3 + $0x88] ss:$16 sps:$4 sm:$0xff]   ;;  %v2672_v24 = vld [vmem:[%s3279_s3 + $0x6c] ss:$16 sps:$4 sm:$0xff]  }
  0x9f   : > { %1143 = vmatpush1.bf16.msra.mxu1 %v2657_v14  ;;  %v2646_v25 = vld [vmem:[%s3279_s3 + $0x4] ss:$16 sps:$4 sm:$0xff]   ;;  %v2675_v26 = vld [vmem:[%s3279_s3 + $0x68] ss:$16 sps:$4 sm:$0xff]   ;;  %v2650_v27 = vld [vmem:[%s3279_s3] ss:$16 sps:$4 sm:$0xff]  }
  0xa0   : > { %1144 = vmatprep.subr.bf16.mxu1 %v2660_v17  ;;  %v2678_v28 = vld [vmem:[%s3279_s3 + $0x4c] ss:$16 sps:$4 sm:$0xff]   ;;  %v2652_v29 = vld [vmem:[%s3279_s3 + $0x1e4] ss:$16 sps:$4 sm:$0xff]   ;;  %v2656_v30 = vld [vmem:[%s3279_s3 + $0x1e0] ss:$16 sps:$4 sm:$0xff]  }
  0xa1   : > { %1032 = vmatpush1.bf16.msra.mxu0 %v2633_v7  ;;  %v2681_v31 = vld [vmem:[%s3279_s3 + $0x48] ss:$16 sps:$4 sm:$0xff]   ;;  %v2684_v32 = vld [vmem:[%s3279_s3 + $0x2c] ss:$16 sps:$4 sm:$0xff]   ;;  %v2658_v33 = vld [vmem:[%s3279_s3 + $0x1c4] ss:$16 sps:$4 sm:$0xff]  }
  0xa2   : > { %1033 = vmatprep.subr.bf16.mxu0 %v2634_v8  ;;  %v2687_v34 = vld [vmem:[%s3279_s3 + $0x28] ss:$16 sps:$4 sm:$0xff]   ;;  %v2702_v35 = vld [vmem:[%s3261_s16 + $0x4] ss:$8 sps:$4 sm:$0xff]   ;;  %v2662_v36 = vld [vmem:[%s3279_s3 + $0x1c0] ss:$16 sps:$4 sm:$0xff]  }
  0xa3   : > { %1145 = vmatpush1.bf16.msra.mxu1 %v2663_v18  ;;  %v2690_v37 = vld [vmem:[%s3279_s3 + $0xc] ss:$16 sps:$4 sm:$0xff]   ;;  %v2664_v38 = vld [vmem:[%s3279_s3 + $0x1a4] ss:$16 sps:$4 sm:$0xff]   ;;  %1059 = vmatprep.mubr.bf16.mxu0 %v2702_v35  ;;  %v2693_v39 = vld [vmem:[%s3279_s3 + $0x8] ss:$16 sps:$4 sm:$0xff]  }
  0xa4   : > { %1146 = vmatprep.subr.bf16.mxu1 %v2666_v20  ;;  %1172 = vmatprep.mubr.bf16.mxu1 %v2702_v35  ;;  %v2668_v40 = vld [vmem:[%s3279_s3 + $0x1a0] ss:$16 sps:$4 sm:$0xff]   ;;  %v2696_v41 = vld [vmem:[%s3279_s3 + $0x1ec] ss:$16 sps:$4 sm:$0xff]   ;;  %v2670_v42 = vld [vmem:[%s3279_s3 + $0x184] ss:$16 sps:$4 sm:$0xff]  }
  0xa5   : > { %1034 = vmatpush1.bf16.msra.mxu0 %v2636_v9  ;;  %v2699_v43 = vld [vmem:[%s3279_s3 + $0x1e8] ss:$16 sps:$4 sm:$0xff]   ;;  %v2674_v44 = vld [vmem:[%s3279_s3 + $0x180] ss:$16 sps:$4 sm:$0xff]   ;;  %v2703_v45 = vld [vmem:[%s3279_s3 + $0x1cc] ss:$16 sps:$4 sm:$0xff]  }
  0xa6   : > { %1035 = vmatprep.subr.bf16.mxu0 %v2637_v12  ;;  %v2676_v46 = vld [vmem:[%s3279_s3 + $0x164] ss:$16 sps:$4 sm:$0xff]   ;;  %v2705_v47 = vld [vmem:[%s3279_s3 + $0x1c8] ss:$16 sps:$4 sm:$0xff]   ;;  %v2680_v48 = vld [vmem:[%s3279_s3 + $0x160] ss:$16 sps:$4 sm:$0xff]  }
  0xa7   : > { %1147 = vmatpush1.bf16.msra.mxu1 %v2669_v23  ;;  %v2706_v49 = vld [vmem:[%s3279_s3 + $0x1ac] ss:$16 sps:$4 sm:$0xff]   ;;  %v2682_v50 = vld [vmem:[%s3279_s3 + $0x144] ss:$16 sps:$4 sm:$0xff]   ;;  %v2708_v51 = vld [vmem:[%s3279_s3 + $0x1a8] ss:$16 sps:$4 sm:$0xff]  }
  0xa8   : > { %1148 = vmatprep.subr.bf16.mxu1 %v2672_v24  ;;  %v2686_v52 = vld [vmem:[%s3279_s3 + $0x140] ss:$16 sps:$4 sm:$0xff]   ;;  %v2712_v53 = vld [vmem:[%s3279_s3 + $0x18c] ss:$16 sps:$4 sm:$0xff]   ;;  %v2688_v54 = vld [vmem:[%s3279_s3 + $0x124] ss:$16 sps:$4 sm:$0xff]  }
  0xa9   : > { %1036 = vmatpush1.bf16.msra.mxu0 %v2639_v15  ;;  %v1509_v55 = vld [vmem:[%s3266_s19] sm:$0xff]  ;;  %v2714_v57 = vld [vmem:[%s3279_s3 + $0x188] ss:$16 sps:$4 sm:$0xff]   ;;  %v2715_v59 = vld [vmem:[%s3279_s3 + $0x16c] ss:$16 sps:$4 sm:$0xff]  }
  0xaa   : > { %1037 = vmatprep.subr.bf16.mxu0 %v2640_v16  ;;  %v1517_v56 = vld [vmem:[%s3266_s19 + $0x40] sm:$0xff]  ;;  %1527 = vperm.xlu0 %2623, %v1509_v55   ;;  %v1518_v62 = vld [vmem:[%s3266_s19 + $0x48] sm:$0xff]  ;;  %v1511_v2 = vld [vmem:[%s3266_s19 + $0x10] sm:$0xff] }
  0xab   : > { %1149 = vmatpush1.bf16.msra.mxu1 %v2675_v26  ;;  %v2692_v58 = vld [vmem:[%s3279_s3 + $0x120] ss:$16 sps:$4 sm:$0xff]   ;;  %v2694_v61 = vld [vmem:[%s3279_s3 + $0x104] ss:$16 sps:$4 sm:$0xff]   ;;  %1567 = vperm.xlu1 %2624, %v1517_v56   ;;  %v2717_v0 = vld [vmem:[%s3279_s3 + $0x168] ss:$16 sps:$4 sm:$0xff]  }
  0xac   : > { %1150 = vmatprep.subr.bf16.mxu1 %v2678_v28  ;;  %v2698_v63 = vld [vmem:[%s3279_s3 + $0x100] ss:$16 sps:$4 sm:$0xff]   ;;  %v2721_v1 = vld [vmem:[%s3279_s3 + $0x14c] ss:$16 sps:$4 sm:$0xff]   ;;  %v2723_v7 = vld [vmem:[%s3279_s3 + $0x148] ss:$16 sps:$4 sm:$0xff]  }
  0xad   : > { %1038 = vmatpush1.bf16.msra.mxu0 %v2642_v19  ;;  %v2700_v3 = vld [vmem:[%s3261_s16] ss:$8 sps:$4 sm:$0xff]   ;;  %v2747_v4 = vld [vmem:[%s3277_s18 + $0x74] ss:$8 sps:$4 sm:$0xff]   ;;  %v2745_v11 = vld [vmem:[%s3277_s18 + $0x70] ss:$8 sps:$4 sm:$0xff]  }
  0xae   : > { %1039 = vmatprep.subr.bf16.mxu0 %v2643_v21  ;;  %1532 = vperm.xlu0 %2623, %v1510_v60   ;;  %v2709_v5 = vld [vmem:[%s3261_s16 + $0x14] ss:$8 sps:$4 sm:$0xff]   ;;  %v2726_v12 = vld [vmem:[%s3279_s3 + $0x128] ss:$16 sps:$4 sm:$0xff]   ;;  %v2750_v13 = vld [vmem:[%s3277_s18 + $0x64] ss:$8 sps:$4 sm:$0xff]  }
  0xaf   : > { %1151 = vmatpush1.bf16.msra.mxu1 %v2681_v31  ;;  %1572 = vperm.xlu1 %2624, %v1518_v62   ;;  %v1512_v6 = vld [vmem:[%s3266_s19 + $0x18] sm:$0xff]  ;;  %v1519_v9 = vld [vmem:[%s3266_s19 + $0x50] sm:$0xff]  ;;  %v1513_v15 = vld [vmem:[%s3266_s19 + $0x20] sm:$0xff] }
  0xb0   : > { %1152 = vmatprep.subr.bf16.mxu1 %v2684_v32  ;;  %v2724_v8 = vld [vmem:[%s3279_s3 + $0x12c] ss:$16 sps:$4 sm:$0xff]   ;;  %v2748_v17 = vld [vmem:[%s3277_s18 + $0x60] ss:$8 sps:$4 sm:$0xff]   ;;  %v2711_v18 = vld [vmem:[%s3261_s16 + $0x10] ss:$8 sps:$4 sm:$0xff]  }
  0xb1   : > { %1040 = vmatpush1.bf16.msra.mxu0 %v2645_v22  ;;  %v1520_v10 = vld [vmem:[%s3266_s19 + $0x58] sm:$0xff]  ;;  %v1514_v16 = vld [vmem:[%s3266_s19 + $0x28] sm:$0xff]  ;;  %v1521_v22 = vld [vmem:[%s3266_s19 + $0x60] sm:$0xff] }
  0xb2   : > { %1041 = vmatprep.subr.bf16.mxu0 %v2646_v25  ;;  %1537 = vperm.xlu0 %2623, %v1511_v2   ;;  %v2730_v14 = vld [vmem:[%s3279_s3 + $0x10c] ss:$16 sps:$4 sm:$0xff]   ;;  %v2732_v19 = vld [vmem:[%s3279_s3 + $0x108] ss:$16 sps:$4 sm:$0xff]   ;;  %v1515_v26 = vld [vmem:[%s3266_s19 + $0x30] sm:$0xff] }
  0xb3   : > { %1153 = vmatpush1.bf16.msra.mxu1 %v2687_v34  ;;  %1542 = vperm.xlu1 %2624, %v1512_v6   ;;  %v2718_v20 = vld [vmem:[%s3261_s16 + $0x24] ss:$8 sps:$4 sm:$0xff]   ;;  %v2753_v21 = vld [vmem:[%s3277_s18 + $0x54] ss:$8 sps:$4 sm:$0xff]   ;;  %v2751_v24 = vld [vmem:[%s3277_s18 + $0x50] ss:$8 sps:$4 sm:$0xff]  }
  0xb4   : > { %1154 = vmatprep.subr.bf16.mxu1 %v2690_v37  ;;  %v1522_v23 = vld [vmem:[%s3266_s19 + $0x68] sm:$0xff]  ;;  %v1524_v31 = vld [vmem:[%s3266_s19 + $0x78] sm:$0xff]  ;;  %v1523_v32 = vld [vmem:[%s3266_s19 + $0x70] sm:$0xff] }
  0xb5   : > { %1042 = vmatpush1.bf16.msra.mxu0 %v2650_v27  ;;  %v2756_v25 = vld [vmem:[%s3277_s18 + $0x44] ss:$8 sps:$4 sm:$0xff]   ;;  %v1516_v27 = vld [vmem:[%s3266_s19 + $0x38] sm:$0xff]  ;;  %v2754_v28 = vld [vmem:[%s3277_s18 + $0x40] ss:$8 sps:$4 sm:$0xff]  }
  0xb6   : > { %1043 = vmatprep.subr.bf16.mxu0 %v2652_v29  ;;  %1577 = vperm.xlu0 %2623, %v1519_v9   ;;  %v2720_v29 = vld [vmem:[%s3261_s16 + $0x20] ss:$8 sps:$4 sm:$0xff]   ;;  %v2733_v34 = vld [vmem:[%s3261_s16 + $0x44] ss:$8 sps:$4 sm:$0xff]   ;;  %v2738_v37 = vld [vmem:[%s3261_s16 + $0x50] ss:$8 sps:$4 sm:$0xff]  }
  0xb7   : > { %1155 = vmatpush1.bf16.msra.mxu1 %v2693_v39  ;;  %1582 = vperm.xlu1 %2624, %v1520_v10   ;;  %v2735_v35 = vld [vmem:[%s3261_s16 + $0x40] ss:$8 sps:$4 sm:$0xff]   ;;  %v2775_v55 = vld [vmem:[%s3277_s18 + $0xd0] ss:$8 sps:$4 sm:$0xff]   ;;  %v2780_v56 = vld [vmem:[%s3277_s18 + $0xc4] ss:$8 sps:$4 sm:$0xff]  }
  0xb8   : > { %1156 = vmatprep.subr.bf16.mxu1 %v2696_v41  ;;  %v2741_v39 = vld [vmem:[%s3261_s16 + $0x60] ss:$8 sps:$4 sm:$0xff]   ;;  %v2744_v41 = vld [vmem:[%s3261_s16 + $0x70] ss:$8 sps:$4 sm:$0xff]   ;;  %v2786_v60 = vld [vmem:[%s3277_s18 + $0xa4] ss:$8 sps:$4 sm:$0xff]  }
  0xb9   : > { %1044 = vmatpush2.bf16.msra.mxu0 %v2656_v30  ;;  %v2727_v30 = vld [vmem:[%s3261_s16 + $0x34] ss:$8 sps:$4 sm:$0xff]  }
  0xba   : > { %1045 = vmatprep.subr.bf16.mxu0 %v2658_v33  ;;  %1547 = vperm.xlu0 %2623, %v1513_v15   ;;  %v2729_v33 = vld [vmem:[%s3261_s16 + $0x30] ss:$8 sps:$4 sm:$0xff]   ;;  %v2789_v62 = vld [vmem:[%s3277_s18 + $0x94] ss:$8 sps:$4 sm:$0xff]  }
  0xbb   : > { %1157 = vmatpush2.bf16.msra.mxu1 %v2699_v43  ;;  %1552 = vperm.xlu1 %2624, %v1514_v16   ;;  %v2757_v43 = vld [vmem:[%s3277_s18 + $0x30] ss:$8 sps:$4 sm:$0xff]  }
  0xbc   : > { %1158 = vmatprep.subr.bf16.mxu1 %v2703_v45  ;;  %v2760_v45 = vld [vmem:[%s3277_s18 + $0x20] ss:$8 sps:$4 sm:$0xff]  }
  0xbd   : > { %1046 = vmatpush2.bf16.msra.mxu0 %v2662_v36  ;;  %v2736_v36 = vld [vmem:[%s3261_s16 + $0x54] ss:$8 sps:$4 sm:$0xff]  }
  0xbe   : > { %1047 = vmatprep.subr.bf16.mxu0 %v2664_v38  ;;  %1587 = vperm.xlu0 %2623, %v1521_v22   ;;  %v2739_v38 = vld [vmem:[%s3261_s16 + $0x64] ss:$8 sps:$4 sm:$0xff]  }
  0xbf   : > { %1159 = vmatpush2.bf16.msra.mxu1 %v2705_v47  ;;  %1592 = vperm.xlu1 %2624, %v1522_v23   ;;  %v2763_v47 = vld [vmem:[%s3277_s18 + $0x10] ss:$8 sps:$4 sm:$0xff]  }
  0xc0   : > { %1160 = vmatprep.subr.bf16.mxu1 %v2706_v49  ;;  %v2766_v49 = vld [vmem:[%s3277_s18] ss:$8 sps:$4 sm:$0xff]  }
  0xc1   : > { %1048 = vmatpush2.bf16.msra.mxu0 %v2668_v40  ;;  %v2742_v40 = vld [vmem:[%s3261_s16 + $0x74] ss:$8 sps:$4 sm:$0xff]  }
  0xc2   : > { %1049 = vmatprep.subr.bf16.mxu0 %v2670_v42  ;;  %1557 = vperm.xlu0 %2623, %v1515_v26   ;;  %v2759_v42 = vld [vmem:[%s3277_s18 + $0x34] ss:$8 sps:$4 sm:$0xff]  }
  0xc3   : > { %1161 = vmatpush2.bf16.msra.mxu1 %v2708_v51  ;;  %1562 = vperm.xlu1 %2624, %v1516_v27   ;;  %v2769_v51 = vld [vmem:[%s3277_s18 + $0xf0] ss:$8 sps:$4 sm:$0xff]  }
  0xc4   : > { %1162 = vmatprep.subr.bf16.mxu1 %v2712_v53  ;;  %v2772_v53 = vld [vmem:[%s3277_s18 + $0xe0] ss:$8 sps:$4 sm:$0xff]  }
  0xc5   : > { %1050 = vmatpush2.bf16.msra.mxu0 %v2674_v44  ;;  %v2762_v44 = vld [vmem:[%s3277_s18 + $0x24] ss:$8 sps:$4 sm:$0xff]  }
  0xc6   : > { %1051 = vmatprep.subr.bf16.mxu0 %v2676_v46  ;;  %1597 = vperm.xlu0 %2623, %v1523_v32   ;;  %v2765_v46 = vld [vmem:[%s3277_s18 + $0x14] ss:$8 sps:$4 sm:$0xff]  }
  0xc7   : > { %1163 = vmatpush2.bf16.msra.mxu1 %v2714_v57  ;;  %1602 = vperm.xlu1 %2624, %v1524_v31   ;;  %v2778_v57 = vld [vmem:[%s3277_s18 + $0xc0] ss:$8 sps:$4 sm:$0xff]  }
  0xc8   : > { %1164 = vmatprep.subr.bf16.mxu1 %v2715_v59  ;;  %v2781_v59 = vld [vmem:[%s3277_s18 + $0xb0] ss:$8 sps:$4 sm:$0xff]  }
  0xc9   : > { %1052 = vmatpush2.bf16.msra.mxu0 %v2680_v48  ;;  %v2768_v48 = vld [vmem:[%s3277_s18 + $0x4] ss:$8 sps:$4 sm:$0xff]  }
  0xca   : > { %1053 = vmatprep.subr.bf16.mxu0 %v2682_v50  ;;  %v2771_v50 = vld [vmem:[%s3277_s18 + $0xf4] ss:$8 sps:$4 sm:$0xff]  }
  0xcb   : > { %1165 = vmatpush2.bf16.msra.mxu1 %v2717_v0  ;;  %v2792_v0 = vld [vmem:[%s3277_s18 + $0x84] ss:$8 sps:$4 sm:$0xff]  }
  0xcc   : > { %1166 = vmatprep.subr.bf16.mxu1 %v2721_v1  ;;  %v2790_v1 = vld [vmem:[%s3277_s18 + $0x80] ss:$8 sps:$4 sm:$0xff]  }
  0xcd   : > { %1054 = vmatpush2.bf16.msra.mxu0 %v2686_v52  ;;  %v2774_v52 = vld [vmem:[%s3277_s18 + $0xe4] ss:$8 sps:$4 sm:$0xff]  }
  0xce   : > { %1055 = vmatprep.subr.bf16.mxu0 %v2688_v54  ;;  %v2777_v54 = vld [vmem:[%s3277_s18 + $0xd4] ss:$8 sps:$4 sm:$0xff]  }
  0xcf   : > { %1167 = vmatpush2.bf16.msra.mxu1 %v2723_v7 }
  0xd0   : > { %1168 = vmatprep.subr.bf16.mxu1 %v2724_v8 }
  0xd1   : > { %1056 = vmatpush2.bf16.msra.mxu0 %v2692_v58  ;;  %v2783_v58 = vld [vmem:[%s3277_s18 + $0xb4] ss:$8 sps:$4 sm:$0xff]  }
  0xd2   : > { %1057 = vmatprep.subr.bf16.mxu0 %v2694_v61  ;;  %v2784_v61 = vld [vmem:[%s3277_s18 + $0xa0] ss:$8 sps:$4 sm:$0xff]  }
  0xd3   : > { %1169 = vmatpush2.bf16.msra.mxu1 %v2726_v12 }
  0xd4   : > { %1170 = vmatprep.subr.bf16.mxu1 %v2730_v14 }
  0xd5   : > { %1058 = vmatpush2.bf16.msra.mxu0 %v2698_v63  ;;  %v2787_v63 = vld [vmem:[%s3277_s18 + $0x90] ss:$8 sps:$4 sm:$0xff]  }
  0xd6   : > { %1877 = vmatprep.subr.bf16.mxu0 %v2747_v4 }
  0xd7   : > { %1171 = vmatpush2.bf16.msra.mxu1 %v2732_v19 }
  0xd8   : > { %1060 = vmatmul.mubr.bf16.vlgmr.msra.gmra.mxu0 %v2700_v3  ;;  %2531 = vmatprep.subr.bf16.mxu1 %v2747_v4 }
  0xd9   : > { %1069 = vmatprep.mubr.bf16.mxu0 %v2709_v5  ;;  %1878 = vmatpush1.bf16.msra.mxu0 %v2745_v11 }
  0xda   : > { %1879 = vmatprep.subr.bf16.mxu0 %v2750_v13  ;;  %1173 = vmatmul.mubr.bf16.vlgmr.msra.gmra.mxu1 %v2700_v3 }
  0xdb   : > { %1182 = vmatprep.mubr.bf16.mxu1 %v2709_v5  ;;  %2547 = vmatpush1.bf16.msra.mxu1 %v2745_v11 }
  0xdc   : > { %2532 = vmatprep.subr.bf16.mxu1 %v2750_v13 }
  0xdd   : > { %1880 = vmatpush1.bf16.msra.mxu0 %v2748_v17 }
  0xde   : > { %1881 = vmatprep.subr.bf16.mxu0 %v2753_v21 }
  0xdf   : > { %2548 = vmatpush1.bf16.msra.mxu1 %v2748_v17 }
  0xe0   : > { %1070 = vmatmul.mubr.bf16.gmra.mxu0 %v2711_v18  ;;  %2533 = vmatprep.subr.bf16.mxu1 %v2753_v21 }
  0xe1   : > { %1079 = vmatprep.mubr.bf16.mxu0 %v2718_v20  ;;  %1882 = vmatpush1.bf16.msra.mxu0 %v2751_v24 }
  0xe2   : > { %1883 = vmatprep.subr.bf16.mxu0 %v2756_v25  ;;  %1183 = vmatmul.mubr.bf16.gmra.mxu1 %v2711_v18 }
  0xe3   : > { %1192 = vmatprep.mubr.bf16.mxu1 %v2718_v20  ;;  %2549 = vmatpush1.bf16.msra.mxu1 %v2751_v24 }
  0xe4   : > { %2534 = vmatprep.subr.bf16.mxu1 %v2756_v25 }
  0xe5   : > { %1884 = vmatpush1.bf16.msra.mxu0 %v2754_v28 }
  0xe6   : > { %1885 = vmatprep.subr.bf16.mxu0 %v2759_v42 }
  0xe7   : > { %2550 = vmatpush1.bf16.msra.mxu1 %v2754_v28 }
  0xe8   : > { %1080 = vmatmul.mubr.bf16.gmra.mxu0 %v2720_v29  ;;  %2535 = vmatprep.subr.bf16.mxu1 %v2759_v42 }
  0xe9   : > { %1089 = vmatprep.mubr.bf16.mxu0 %v2727_v30  ;;  %1886 = vmatpush1.bf16.msra.mxu0 %v2757_v43 }
  0xea   : > { %1193 = vmatmul.mubr.bf16.gmra.mxu1 %v2720_v29  ;;  %1887 = vmatprep.subr.bf16.mxu0 %v2762_v44 }
  0xeb   : > { %1202 = vmatprep.mubr.bf16.mxu1 %v2727_v30  ;;  %2551 = vmatpush1.bf16.msra.mxu1 %v2757_v43 }
  0xec   : > { %2536 = vmatprep.subr.bf16.mxu1 %v2762_v44 }
  0xed   : > { %1888 = vmatpush1.bf16.msra.mxu0 %v2760_v45 }
  0xee   : > { %1889 = vmatprep.subr.bf16.mxu0 %v2765_v46 }
  0xef   : > { %2552 = vmatpush1.bf16.msra.mxu1 %v2760_v45 }
  0xf0   : > { %1090 = vmatmul.mubr.bf16.gmra.mxu0 %v2729_v33  ;;  %2537 = vmatprep.subr.bf16.mxu1 %v2765_v46 }
  0xf1   : > { %1099 = vmatprep.mubr.bf16.mxu0 %v2733_v34  ;;  %1890 = vmatpush1.bf16.msra.mxu0 %v2763_v47 }
  0xf2   : > { %1203 = vmatmul.mubr.bf16.gmra.mxu1 %v2729_v33  ;;  %1891 = vmatprep.subr.bf16.mxu0 %v2768_v48 }
  0xf3   : > { %1212 = vmatprep.mubr.bf16.mxu1 %v2733_v34  ;;  %2553 = vmatpush1.bf16.msra.mxu1 %v2763_v47 }
  0xf4   : > { %2538 = vmatprep.subr.bf16.mxu1 %v2768_v48 }
  0xf5   : > { %1892 = vmatpush1.bf16.msra.mxu0 %v2766_v49 }
  0xf6   : > { %1893 = vmatprep.subr.bf16.mxu0 %v2771_v50 }
  0xf7   : > { %2554 = vmatpush1.bf16.msra.mxu1 %v2766_v49 }
  0xf8   : > { %1100 = vmatmul.mubr.bf16.gmra.mxu0 %v2735_v35  ;;  %2539 = vmatprep.subr.bf16.mxu1 %v2771_v50 }
  0xf9   : > { %1109 = vmatprep.mubr.bf16.mxu0 %v2736_v36  ;;  %1894 = vmatpush2.bf16.msra.mxu0 %v2769_v51 }
  0xfa   : > { %1213 = vmatmul.mubr.bf16.gmra.mxu1 %v2735_v35  ;;  %1895 = vmatprep.subr.bf16.mxu0 %v2774_v52 }
  0xfb   : > { %1222 = vmatprep.mubr.bf16.mxu1 %v2736_v36  ;;  %2555 = vmatpush2.bf16.msra.mxu1 %v2769_v51 }
  0xfc   : > { %2540 = vmatprep.subr.bf16.mxu1 %v2774_v52 }
  0xfd   : > { %1896 = vmatpush2.bf16.msra.mxu0 %v2772_v53 }
  0xfe   : > { %1897 = vmatprep.subr.bf16.mxu0 %v2777_v54 }
  0xff   : > { %2556 = vmatpush2.bf16.msra.mxu1 %v2772_v53 }
 0x100   : > { %1110 = vmatmul.mubr.bf16.gmra.mxu0 %v2738_v37  ;;  %2541 = vmatprep.subr.bf16.mxu1 %v2777_v54 }
 0x101   : > { %1119 = vmatprep.mubr.bf16.mxu0 %v2739_v38  ;;  %1898 = vmatpush2.bf16.msra.mxu0 %v2775_v55 }
 0x102   : > { %1223 = vmatmul.mubr.bf16.gmra.mxu1 %v2738_v37  ;;  %1899 = vmatprep.subr.bf16.mxu0 %v2780_v56 }
 0x103   : > { %1232 = vmatprep.mubr.bf16.mxu1 %v2739_v38  ;;  %2557 = vmatpush2.bf16.msra.mxu1 %v2775_v55 }
 0x104   : > { %2542 = vmatprep.subr.bf16.mxu1 %v2780_v56 }
 0x105   : > { %1900 = vmatpush2.bf16.msra.mxu0 %v2778_v57 }
 0x106   : > { %1901 = vmatprep.subr.bf16.mxu0 %v2783_v58 }
 0x107   : > { %2558 = vmatpush2.bf16.msra.mxu1 %v2778_v57 }
 0x108   : > { %1120 = vmatmul.mubr.bf16.gmra.mxu0 %v2741_v39  ;;  %2543 = vmatprep.subr.bf16.mxu1 %v2783_v58 }
 0x109   : > { %1129 = vmatprep.mubr.bf16.mxu0 %v2742_v40  ;;  %1902 = vmatpush2.bf16.msra.mxu0 %v2781_v59 }
 0x10a   : > { %1233 = vmatmul.mubr.bf16.gmra.mxu1 %v2741_v39  ;;  %1903 = vmatprep.subr.bf16.mxu0 %v2786_v60 }
 0x10b   : > { %1242 = vmatprep.mubr.bf16.mxu1 %v2742_v40  ;;  %2559 = vmatpush2.bf16.msra.mxu1 %v2781_v59 }
 0x10c   : > { %2544 = vmatprep.subr.bf16.mxu1 %v2786_v60 }
 0x10d   : > { %1904 = vmatpush2.bf16.msra.mxu0 %v2784_v61 }
 0x10e   : > { %1905 = vmatprep.subr.bf16.mxu0 %v2789_v62 }
 0x10f   : > { %2560 = vmatpush2.bf16.msra.mxu1 %v2784_v61 }
 0x110   : > { %1130 = vmatmul.mubr.bf16.gmra.mxu0 %v2744_v41  ;;  %2545 = vmatprep.subr.bf16.mxu1 %v2789_v62 }
 0x111   : > { %1906 = vmatpush2.bf16.msra.mxu0 %v2787_v63 }
 0x112   : > { %1243 = vmatmul.mubr.bf16.gmra.mxu1 %v2744_v41  ;;  %1907 = vmatprep.subr.bf16.mxu0 %v2792_v0 }
 0x113   : > { %2561 = vmatpush2.bf16.msra.mxu1 %v2787_v63 }
 0x114   : > { %2546 = vmatprep.subr.bf16.mxu1 %v2792_v0 }
 0x115   : > { %1908 = vmatpush2.bf16.msra.mxu0 %v2790_v1 }
 0x117   : > { %2562 = vmatpush2.bf16.msra.mxu1 %v2790_v1 }
 0x125   : > { %v3476_v56 = vpop.permute.xlu0 %1527 }
 0x126   : > { %v3469_v50 = vpop.permute.xlu1 %1567 }
 0x198   : > { %v3411_v2 = vpop.f32.mrf.mxu0 }
 0x199   : > { %v2430_v3 = vmul.f32 -1.442695, %v3411_v2 }
 0x19a   : > { %v3414_v4 = vpop.f32.mrf.mxu0  ;;  %v3429_v14 = vpop.f32.mrf.mxu1 }
 0x19b   : > { %2793 = vpow2.f32 %v2430_v3  ;;  %v2431_v5 = vmul.f32 -1.442695, %v3414_v4 }
 0x19c   : > { %v3417_v6 = vpop.f32.mrf.mxu0  ;;  %v3434_v17 = vpop.f32.mrf.mxu1 }
 0x19d   : > { %2795 = vpow2.f32 %v2431_v5  ;;  %v2432_v7 = vmul.f32 -1.442695, %v3417_v6 }
 0x19e   : > { %v3420_v8 = vpop.f32.mrf.mxu0  ;;  %v3439_v20 = vpop.f32.mrf.mxu1 }
 0x19f   : > { %2797 = vpow2.f32 %v2432_v7  ;;  %v2433_v9 = vmul.f32 -1.442695, %v3420_v8  ;;  %v3489_v7 = vpop.permute.xlu1 %1572 }
 0x1a0   : > { %v3423_v10 = vpop.f32.mrf.mxu0  ;;  %v3444_v25 = vpop.f32.mrf.mxu1 }
 0x1a1   : > { %2799 = vpow2.f32 %v2433_v9  ;;  %v2434_v11 = vmul.f32 -1.442695, %v3423_v10 }
 0x1a2   : > { %v3426_v12 = vpop.f32.mrf.mxu0  ;;  %v3449_v30 = vpop.f32.mrf.mxu1 }
 0x1a3   : > { %2801 = vpow2.f32 %v2434_v11  ;;  %v2435_v13 = vmul.f32 -1.442695, %v3426_v12 }
 0x1a4   : > { %v3431_v15 = vpop.f32.mrf.mxu0  ;;  %v3454_v35 = vpop.f32.mrf.mxu1 }
 0x1a5   : > { %2803 = vpow2.f32 %v2435_v13  ;;  %v2436_v16 = vmul.f32 -1.442695, %v3431_v15 }
 0x1a6   : > { %v3436_v18 = vpop.f32.mrf.mxu0  ;;  %v3459_v40 = vpop.f32.mrf.mxu1 }
 0x1a7   : > { %2805 = vpow2.f32 %v2436_v16  ;;  %v2437_v19 = vmul.f32 -1.442695, %v3436_v18 }
 0x1a8   : > { %v2794_v21 = vpop.eup %2793  ;;  %v3441_v22 = vpop.f32.mrf.mxu0 }
 0x1a9   : > { %v1349_v23 = vadd.f32 1.0, %v2794_v21  ;;  %2807 = vpow2.f32 %v2437_v19  ;;  %v2438_v24 = vmul.f32 -1.442695, %v3441_v22  ;;  %v3464_v45 = vpop.f32.mrf.mxu1 }
 0x1aa   : > { %v2796_v26 = vpop.eup %2795  ;;  %v3446_v27 = vpop.f32.mrf.mxu0 }
 0x1ab   : > { %2809 = vrcp.f32 %v1349_v23  ;;  %v1350_v28 = vadd.f32 1.0, %v2796_v26  ;;  %v2439_v29 = vmul.f32 -1.442695, %v3446_v27  ;;  %v3471_v51 = vpop.f32.mrf.mxu1 }
 0x1ac   : > { %v2798_v31 = vpop.eup %2797  ;;  %2811 = vpow2.f32 %v2438_v24  ;;  %v3451_v32 = vpop.f32.mrf.mxu0 }
 0x1ad   : > { %2813 = vrcp.f32 %v1350_v28  ;;  %v1351_v33 = vadd.f32 1.0, %v2798_v31  ;;  %v2440_v34 = vmul.f32 -1.442695, %v3451_v32  ;;  %v3478_v57 = vpop.f32.mrf.mxu1  ;;  %v1533_v24 = vpop.permute.xlu0 %1532 }
 0x1ae   : > { %v2800_v36 = vpop.eup %2799  ;;  %2815 = vpow2.f32 %v2439_v29  ;;  %v3456_v37 = vpop.f32.mrf.mxu0 }
 0x1af   : > { %2817 = vrcp.f32 %v1351_v33  ;;  %v1352_v38 = vadd.f32 1.0, %v2800_v36  ;;  %v2441_v39 = vmul.f32 -1.442695, %v3456_v37  ;;  %v3483_v62 = vpop.f32.mrf.mxu1 }
 0x1b0   : > { %v2802_v41 = vpop.eup %2801  ;;  %2819 = vpow2.f32 %v2440_v34  ;;  %v3461_v42 = vpop.f32.mrf.mxu0 }
 0x1b1   : > { %2821 = vrcp.f32 %v1352_v38  ;;  %v1353_v43 = vadd.f32 1.0, %v2802_v41  ;;  %v2442_v44 = vmul.f32 -1.442695, %v3461_v42  ;;  %v3491_v9 = vpop.f32.mrf.mxu1 }
 0x1b2   : > { %v2804_v46 = vpop.eup %2803  ;;  %2823 = vpow2.f32 %v2441_v39  ;;  %v3466_v47 = vpop.f32.mrf.mxu0 }
 0x1b3   : > { %2825 = vrcp.f32 %v1353_v43  ;;  %v1354_v48 = vadd.f32 1.0, %v2804_v46  ;;  %v2443_v49 = vmul.f32 -1.442695, %v3466_v47 }
 0x1b4   : > { %v2806_v52 = vpop.eup %2805  ;;  %2827 = vpow2.f32 %v2442_v44  ;;  %v3473_v53 = vpop.f32.mrf.mxu0 }
 0x1b5   : > { %2829 = vrcp.f32 %v1354_v48  ;;  %v1355_v54 = vadd.f32 1.0, %v2806_v52  ;;  %v2444_v55 = vmul.f32 -1.442695, %v3473_v53 }
 0x1b6   : > { %v2808_v58 = vpop.eup %2807  ;;  %2831 = vpow2.f32 %v2443_v49  ;;  %v3480_v59 = vpop.f32.mrf.mxu0 }
 0x1b7   : > { %2833 = vrcp.f32 %v1355_v54  ;;  %v1356_v60 = vadd.f32 1.0, %v2808_v58  ;;  %v2445_v61 = vmul.f32 -1.442695, %v3480_v59 }
 0x1b8   : > { %v2810_v63 = vpop.eup %2809  ;;  %2835 = vpow2.f32 %v2444_v55  ;;  %v3485_v0 = vpop.f32.mrf.mxu0 }
 0x1b9   : > { %v2812_v1 = vpop.eup %2811  ;;  %v1445_v3 = vmul.f32 %v2810_v63, %v3411_v2  ;;  %2837 = vrcp.f32 %v1356_v60  ;;  %v2446_v5 = vmul.f32 -1.442695, %v3485_v0  ;;  %v3497_v2 = vpop.f32.mrf.mxu1 }
 0x1ba   : > { %v2814_v11 = vpop.eup %2813  ;;  %v1357_v13 = vadd.f32 1.0, %v2812_v1  ;;  %2839 = vpow2.f32 %v2445_v61  ;;  %v3493_v16 = vpop.f32.mrf.mxu0 }
 0x1bb   : > { %v2816_v19 = vpop.eup %2815  ;;  %v1446_v21 = vmul.f32 %v2814_v11, %v3414_v4  ;;  %2841 = vpow2.f32 %v2446_v5  ;;  %v2447_v23 = vmul.f32 -1.442695, %v3493_v16  ;;  %v1477_v34 = vmul.f32 %v1445_v3, %v3429_v14  ;;  %v3503_v36 = vpop.f32.mrf.mxu1 }
 0x1bc   : > { %v2818_v26 = vpop.eup %2817  ;;  %2843 = vrcp.f32 %v1357_v13  ;;  %v1358_v28 = vadd.f32 1.0, %v2816_v19  ;;  %v3499_v29 = vpop.f32.mrf.mxu0 }
 0x1bd   : > { %v2820_v31 = vpop.eup %2819  ;;  %v1447_v33 = vmul.f32 %v2818_v26, %v3417_v6  ;;  %2845 = vpow2.f32 %v2447_v23  ;;  %v2448_v39 = vmul.f32 -1.442695, %v3499_v29  ;;  %v1478_v46 = vmul.f32 %v1446_v21, %v3434_v17  ;;  %v3512_v14 = vpop.permute.xlu1 %1542 }
 0x1be   : > { %v2822_v4 = vpop.eup %2821  ;;  %2847 = vrcp.f32 %v1358_v28  ;;  %v1359_v38 = vadd.f32 1.0, %v2820_v31  ;;  %v3506_v41 = vpop.f32.mrf.mxu0 }
 0x1bf   : > { %v2824_v43 = vpop.eup %2823  ;;  %v1448_v44 = vmul.f32 %v2822_v4, %v3420_v8  ;;  %v1479_v48 = vmul.f32 %v1447_v33, %v3439_v20  ;;  %v2449_v6 = vmul.f32 -1.442695, %v3506_v41  ;;  %v3514_v49 = vpop.f32.mrf.mxu1  ;;  %v1605_v8 = vmul.f32 %v3476_v56, %v1477_v34 }
 0x1c0   : > { %v2826_v52 = vpop.eup %2825  ;;  %2849 = vrcp.f32 %v1359_v38  ;;  %v1360_v54 = vadd.f32 1.0, %v2824_v43  ;;  %v3516_v55 = vpop.f32.mrf.mxu0 }
 0x1c1   : > { %v2828_v58 = vpop.eup %2827  ;;  %v1480_v60 = vmul.f32 %v1448_v44, %v3444_v25  ;;  %2851 = vpow2.f32 %v2448_v39  ;;  %v3520_v17 = vpop.permute.xlu0 %1537  ;;  %v1607_v1 = vmul.f32 %v1533_v24, %v1479_v48  ;;  %v2450_v3 = vmul.f32 -1.442695, %v3516_v55 }
 0x1c2   : > { %v3522_v20 = vpop.f32.mrf.mxu1  ;;  %v2830_v61 = vpop.eup %2829  ;;  %2853 = vrcp.f32 %v1360_v54  ;;  %v1361_v63 = vadd.f32 1.0, %v2828_v58  ;;  %v1606_v25 = vmul.f32 %v3476_v56, %v1478_v46  ;;  %v1449_v26 = vmul.f32 %v2826_v52, %v3423_v10 }
 0x1c3   : > { %v3525_v5 = vpop.f32.mrf.mxu0  ;;  %v2832_v11 = vpop.eup %2831  ;;  %v1450_v13 = vmul.f32 %v2830_v61, %v3426_v12  ;;  %2855 = vpow2.f32 %v2449_v6  ;;  %v1608_v19 = vmul.f32 %v1533_v24, %v1480_v60  ;;  %v1669_v43 = vpack.c.bf16 %v1607_v1, %v1605_v8 }
 0x1c4   : > { %v3529_v21 = vpop.f32.mrf.mxu1  ;;  %v2834_v23 = vpop.eup %2833  ;;  %2857 = vrcp.f32 %v1361_v63  ;;  %v1362_v28 = vadd.f32 1.0, %v2832_v11  ;;  %v2451_v31 = vmul.f32 -1.442695, %v3525_v5  ;;  %v1481_v8 = vmul.f32 %v1449_v26, %v3449_v30 }
 0x1c5   : > { %v3533_v33 = vpop.f32.mrf.mxu0  ;;  %v2836_v34 = vpop.eup %2835  ;;  %v1451_v4 = vmul.f32 %v2834_v23, %v3431_v15  ;;  %v1670_v38 = vpack.c.bf16 %v1608_v19, %v1606_v25  ;;  %2859 = vpow2.f32 %v2450_v3  ;;  %v1482_v6 = vmul.f32 %v1450_v13, %v3454_v35 }
 0x1c6   : > { %v3536_v12 = vpop.permute.xlu1 %1582  ;;  %v3538_v56 = vpop.f32.mrf.mxu1  ;;  %2861 = vrcp.f32 %v1362_v28  ;;  %v1363_v39 = vadd.f32 1.0, %v2836_v34  ;;  %v2452_v10 = vmul.f32 -1.442695, %v3533_v33 }
 0x1c7   : > { %v2838_v24 = vpop.eup %2837  ;;  %v3541_v44 = vpop.f32.mrf.mxu0  ;;  %v1483_v15 = vmul.f32 %v1451_v4, %v3459_v40  ;;  %2863 = vpow2.f32 %v2451_v31  ;;  %1909 = vmatprep.mubr.bf16.mxu0 %v1670_v38  ;;  %v1610_v23 = vmul.f32 %v3520_v17, %v1482_v6  ;;  %v1609_v31 = vmul.f32 %v3520_v17, %v1481_v8 }
 0x1c8   : > { %v2840_v46 = vpop.eup %2839  ;;  %v1452_v48 = vmul.f32 %v2838_v24, %v3436_v18  ;;  %v3546_v52 = vpop.permute.xlu0 %1577  ;;  %2865 = vrcp.f32 %v1363_v39  ;;  %v2453_v61 = vmul.f32 -1.442695, %v3541_v44  ;;  %1910 = vmatmul.mubr.bf16.vlgmr.msra.gmra.mxu0 %v1669_v43 }
 0x1c9   : > { %v3548_v54 = vpop.f32.mrf.mxu1  ;;  %v2842_v58 = vpop.eup %2841  ;;  %v1364_v60 = vadd.f32 1.0, %v2840_v46  ;;  %2867 = vpow2.f32 %v2452_v10  ;;  %v1611_v3 = vmul.f32 %v3512_v14, %v1483_v15 }
 0x1ca   : > { %v3552_v63 = vpop.f32.mrf.mxu0  ;;  %v2844_v18 = vpop.eup %2843  ;;  %v1365_v35 = vadd.f32 1.0, %v2842_v58  ;;  %v1484_v40 = vmul.f32 %v1452_v48, %v3464_v45 }
 0x1cb   : > { %v2846_v1 = vpop.eup %2845  ;;  %2869 = vrcp.f32 %v1364_v60  ;;  %v2454_v11 = vmul.f32 -1.442695, %v3552_v63  ;;  %v3559_v25 = vpop.f32.mrf.mxu1  ;;  %v1453_v24 = vmul.f32 %v2844_v18, %v3441_v22  ;;  %v1671_v48 = vpack.c.bf16 %v1611_v3, %v1609_v31 }
 0x1cc   : > { %v3557_v13 = vpop.f32.mrf.mxu0  ;;  %v2848_v30 = vpop.eup %2847  ;;  %2871 = vrcp.f32 %v1365_v35  ;;  %v1366_v19 = vadd.f32 1.0, %v2846_v1  ;;  %v1612_v26 = vmul.f32 %v3512_v14, %v1484_v40 }
 0x1cd   : > { %v1553_v28 = vpop.permute.xlu1 %1552  ;;  %v1454_v45 = vmul.f32 %v2848_v30, %v3446_v27  ;;  %2873 = vpow2.f32 %v2453_v61  ;;  %v2455_v34 = vmul.f32 -1.442695, %v3557_v13  ;;  %v2850_v38 = vpop.eup %2849  ;;  %v1485_v40 = vmul.f32 %v1453_v24, %v3471_v51 }
 0x1ce   : > { %v3566_v4 = vpop.f32.mrf.mxu0  ;;  %2875 = vrcp.f32 %v1366_v19  ;;  %v1672_v39 = vpack.c.bf16 %v1612_v26, %v1610_v23  ;;  %v1548_v43 = vpop.permute.xlu0 %1547  ;;  %v1455_v14 = vmul.f32 %v2850_v38, %v3451_v32 }
 0x1cf   : > { %v2456_v10 = vmul.f32 -1.442695, %v3566_v4  ;;  %v2852_v46 = vpop.eup %2851  ;;  %2877 = vpow2.f32 %v2454_v11  ;;  %v3573_v17 = vpop.f32.mrf.mxu1  ;;  %v1486_v8 = vmul.f32 %v1454_v45, %v3478_v57 }
 0x1d0   : > { %v3571_v27 = vpop.f32.mrf.mxu0  ;;  %v2854_v6 = vpop.eup %2853  ;;  %v1367_v15 = vadd.f32 1.0, %v2852_v46  ;;  %2879 = vpow2.f32 %v2455_v34  ;;  %1919 = vmatprep.mubr.bf16.mxu0 %v1672_v39  ;;  %v1487_v61 = vmul.f32 %v1455_v14, %v3483_v62  ;;  %v1613_v46 = vmul.f32 %v1548_v43, %v1485_v40 }
 0x1d1   : > { %v2457_v58 = vmul.f32 -1.442695, %v3571_v27  ;;  %v2856_v22 = vpop.eup %2855  ;;  %v1456_v60 = vmul.f32 %v2854_v6, %v3456_v37  ;;  %2881 = vpow2.f32 %v2456_v10  ;;  %1920 = vmatmul.mubr.bf16.gmra.mxu0 %v1671_v48  ;;  %v3582_v1 = vpop.permute.xlu1 %1592  ;;  %v1614_v51 = vmul.f32 %v1548_v43, %v1486_v8 }
 0x1d2   : > { %v3579_v32 = vpop.f32.mrf.mxu0  ;;  %v2858_v18 = vpop.eup %2857  ;;  %2883 = vrcp.f32 %v1367_v15  ;;  %v1368_v35 = vadd.f32 1.0, %v2856_v22  ;;  %v1615_v23 = vmul.f32 %v1553_v28, %v1487_v61 }
 0x1d3   : > { %v2860_v3 = vpop.eup %2859  ;;  %v1488_v11 = vmul.f32 %v1456_v60, %v3491_v9  ;;  %2885 = vpow2.f32 %v2457_v58  ;;  %v2458_v37 = vmul.f32 -1.442695, %v3579_v32  ;;  %v3588_v62 = vpop.f32.mrf.mxu1  ;;  %v1457_v39 = vmul.f32 %v2858_v18, %v3461_v42 }
 0x1d4   : > { %v3586_v57 = vpop.f32.mrf.mxu0  ;;  %v2862_v30 = vpop.eup %2861  ;;  %2887 = vrcp.f32 %v1368_v35  ;;  %v1369_v19 = vadd.f32 1.0, %v2860_v3  ;;  %v1673_v60 = vpack.c.bf16 %v1615_v23, %v1613_v46 }
 0x1d5   : > { %v2864_v26 = vpop.eup %2863  ;;  %v1458_v45 = vmul.f32 %v2862_v30, %v3466_v47  ;;  %v1616_v31 = vmul.f32 %v1553_v28, %v1488_v11  ;;  %v3591_v34 = vpop.permute.xlu0 %1587  ;;  %v2459_v9 = vmul.f32 -1.442695, %v3586_v57  ;;  %v1489_v40 = vmul.f32 %v1457_v39, %v3497_v2 }
 0x1d6   : > { %v3594_v38 = vpop.f32.mrf.mxu0  ;;  %v2866_v24 = vpop.eup %2865  ;;  %2889 = vrcp.f32 %v1369_v19  ;;  %v1370_v10 = vadd.f32 1.0, %v2864_v26 }
 0x1d7   : > { %v2868_v14 = vpop.eup %2867  ;;  %v1459_v48 = vmul.f32 %v2866_v24, %v3473_v53  ;;  %v1674_v6 = vpack.c.bf16 %v1616_v31, %v1614_v51  ;;  %2891 = vpow2.f32 %v2458_v37  ;;  %v2460_v47 = vmul.f32 -1.442695, %v3594_v38  ;;  %v3601_v15 = vpop.f32.mrf.mxu1 }
 0x1d8   : > { %v3599_v28 = vpop.f32.mrf.mxu0  ;;  %v2870_v58 = vpop.eup %2869  ;;  %2893 = vrcp.f32 %v1370_v10  ;;  %v1371_v22 = vadd.f32 1.0, %v2868_v14  ;;  %v1490_v61 = vmul.f32 %v1458_v45, %v3503_v36 }
 0x1d9   : > { %v2461_v42 = vmul.f32 -1.442695, %v3599_v28  ;;  %v2872_v8 = vpop.eup %2871  ;;  %v1460_v43 = vmul.f32 %v2870_v58, %v3480_v59  ;;  %v1491_v53 = vmul.f32 %v1459_v48, %v3514_v49  ;;  %2895 = vpow2.f32 %v2459_v9  ;;  %1929 = vmatprep.mubr.bf16.mxu0 %v1674_v6  ;;  %v1563_v18 = vpop.permute.xlu1 %1562 }
 0x1da   : > { %v2874_v35 = vpop.eup %2873  ;;  %2897 = vrcp.f32 %v1371_v22  ;;  %1930 = vmatmul.mubr.bf16.gmra.mxu0 %v1673_v60  ;;  %v1558_v30 = vpop.permute.xlu0 %1557 }
 0x1db   : > { %v2876_v3 = vpop.eup %2875  ;;  %v1372_v11 = vadd.f32 1.0, %v2874_v35  ;;  %v1492_v37 = vmul.f32 %v1460_v43, %v3522_v20  ;;  %2899 = vpow2.f32 %v2460_v47  ;;  %v3609_v19 = vpop.f32.mrf.mxu1  ;;  %v1619_v36 = vmul.f32 %v1563_v18, %v1491_v53 }
 0x1dc   : > { %v2878_v59 = vpop.eup %2877  ;;  %2901 = vpow2.f32 %v2461_v42  ;;  %v1618_v26 = vmul.f32 %v1558_v30, %v1490_v61  ;;  %v1462_v2 = vmul.f32 %v2876_v3, %v3493_v16  ;;  %v1617_v9 = vmul.f32 %v1558_v30, %v1489_v40 }
 0x1dd   : > { %v2880_v49 = vpop.eup %2879  ;;  %2903 = vrcp.f32 %v1372_v11  ;;  %v1373_v23 = vadd.f32 1.0, %v2878_v59  ;;  %v1620_v45 = vmul.f32 %v1563_v18, %v1492_v37  ;;  %v1461_v20 = vmul.f32 %v2872_v8, %v3485_v0  ;;  %v3613_v46 = vpop.f32.mrf.mxu1 }
 0x1de   : > { %v2882_v51 = vpop.eup %2881  ;;  %v1374_v31 = vadd.f32 1.0, %v2880_v49  ;;  %v1675_v6 = vpack.c.bf16 %v1619_v36, %v1617_v9  ;;  %v1494_v22 = vmul.f32 %v1462_v2, %v3538_v56 }
 0x1df   : > { %v2884_v24 = vpop.eup %2883  ;;  %2905 = vrcp.f32 %v1373_v23  ;;  %v1375_v39 = vadd.f32 1.0, %v2882_v51  ;;  %v1676_v10 = vpack.c.bf16 %v1620_v45, %v1618_v26  ;;  %v1493_v42 = vmul.f32 %v1461_v20, %v3529_v21  ;;  %v1236_v8 = vpop.f32.mrf.mxu1 }
 0x1e0   : > { %v2886_v14 = vpop.eup %2885  ;;  %v1463_v48 = vmul.f32 %v2884_v24, %v3499_v29  ;;  %2907 = vrcp.f32 %v1374_v31 }
 0x1e1   : > { %v2888_v47 = vpop.eup %2887  ;;  %2909 = vrcp.f32 %v1375_v39  ;;  %v1376_v58 = vadd.f32 1.0, %v2886_v14  ;;  %1939 = vmatprep.mubr.bf16.mxu0 %v1676_v10  ;;  %v1621_v11 = vmul.f32 %v3469_v50, %v1493_v42  ;;  %v1238_v21 = vpop.f32.mrf.mxu1 }
 0x1e2   : > { %v1464_v16 = vmul.f32 %v2888_v47, %v3506_v41  ;;  %v1495_v0 = vmul.f32 %v1463_v48, %v3548_v54  ;;  %1940 = vmatmul.mubr.bf16.gmra.mxu0 %v1675_v6  ;;  %v1622_v41 = vmul.f32 %v3469_v50, %v1494_v22 }
 0x1e3   : > { %v2890_v60 = vpop.eup %2889  ;;  %2911 = vrcp.f32 %v1376_v58 }
 0x1e4   : > { %v2892_v43 = vpop.eup %2891  ;;  %v1496_v29 = vmul.f32 %v1464_v16, %v3559_v25  ;;  %v1623_v18 = vmul.f32 %v3489_v7, %v1495_v0  ;;  %v1465_v30 = vmul.f32 %v2890_v60, %v3516_v55  ;;  %v1240_v55 = vpop.f32.mrf.mxu1 }
 0x1e5   : > { %v2894_v61 = vpop.eup %2893  ;;  %v1377_v53 = vadd.f32 1.0, %v2892_v43 }
 0x1e6   : > { %v2896_v35 = vpop.eup %2895  ;;  %v1624_v56 = vmul.f32 %v3489_v7, %v1496_v29  ;;  %v1466_v54 = vmul.f32 %v2894_v61, %v3525_v5  ;;  %v1677_v23 = vpack.c.bf16 %v1623_v18, %v1621_v11  ;;  %v1244_v39 = vpop.f32.mrf.mxu1 }
 0x1e7   : > { %v2898_v40 = vpop.eup %2897  ;;  %v1378_v3 = vadd.f32 1.0, %v2896_v35  ;;  %2913 = vrcp.f32 %v1377_v53 }
 0x1e8   : > { %v2900_v37 = vpop.eup %2899  ;;  %v1467_v25 = vmul.f32 %v2898_v40, %v3533_v33  ;;  %v1678_v59 = vpack.c.bf16 %v1624_v56, %v1622_v41  ;;  %v1498_v50 = vmul.f32 %v1466_v54, %v3588_v62  ;;  %v1497_v33 = vmul.f32 %v1465_v30, %v3573_v17  ;;  %v1246_v16 = vpop.f32.mrf.mxu1 }
 0x1e9   : > { %v2902_v36 = vpop.eup %2901  ;;  %2915 = vrcp.f32 %v1378_v3  ;;  %v1379_v49 = vadd.f32 1.0, %v2900_v37  ;;  %v1598_v54 = vpop.permute.xlu0 %1597 }
 0x1ea   : > { %v2904_v26 = vpop.eup %2903  ;;  %v1380_v7 = vadd.f32 1.0, %v2902_v36  ;;  %v1499_v45 = vmul.f32 %v1467_v25, %v3601_v15  ;;  %1949 = vmatprep.mubr.bf16.mxu1 %v1678_v59  ;;  %v1625_v17 = vmul.f32 %v3546_v52, %v1497_v33  ;;  %v1248_v60 = vpop.f32.mrf.mxu1  ;;  %v1639_v36 = vld [vmem:[#allocation2 + $0xd8] sm:$0xff] }
 0x1eb   : > { %v1468_v5 = vmul.f32 %v2904_v26, %v3541_v44  ;;  %2917 = vrcp.f32 %v1379_v49  ;;  %1950 = vmatmul.mubr.bf16.vlgmr.msra.gmra.mxu1 %v1677_v23  ;;  %v1626_v44 = vmul.f32 %v3546_v52, %v1498_v50  ;;  %v1640_v26 = vld [vmem:[#allocation2 + $0x18] sm:$0xff] }
 0x1ec   : > { %v2906_v51 = vpop.eup %2905  ;;  %2919 = vrcp.f32 %v1380_v7  ;;  %v1627_v15 = vmul.f32 %v3536_v12, %v1499_v45  ;;  %v1250_v56 = vpop.f32.mrf.mxu1 }
 0x1ed   : > { %v2908_v2 = vpop.eup %2907  ;;  %v1500_v31 = vmul.f32 %v1468_v5, %v3609_v19  ;;  %v1469_v14 = vmul.f32 %v2906_v51, %v3552_v63  ;;  %v1641_v5 = vld [vmem:[#allocation2 + $0x50] sm:$0xff]  ;;  %v1642_v51 = vld [vmem:[#allocation2 + $0x68] sm:$0xff] }
 0x1ee   : > { %v2910_v9 = vpop.eup %2909  ;;  %v1470_v24 = vmul.f32 %v2908_v2, %v3557_v13  ;;  %v1679_v13 = vpack.c.bf16 %v1627_v15, %v1625_v17  ;;  %v1644_v15 = vld [vmem:[#allocation2 + $0x48] sm:$0xff] }
 0x1ef   : > { %v1471_v20 = vmul.f32 %v2910_v9, %v3566_v4  ;;  %v1628_v62 = vmul.f32 %v3536_v12, %v1500_v31  ;;  %v1501_v4 = vmul.f32 %v1469_v14, %v3613_v46  ;;  %v1643_v31 = vld [vmem:[#allocation2 + $0x30] sm:$0xff]  ;;  %v1646_v14 = vld [vmem:[#allocation2 + $0x88] sm:$0xff] }
 0x1f0   : > { %v2912_v10 = vpop.eup %2911  ;;  %v1502_v19 = vmul.f32 %v1470_v24, %v1236_v8 }
 0x1f1   : > { %v1472_v48 = vmul.f32 %v2912_v10, %v3571_v27  ;;  %v1680_v6 = vpack.c.bf16 %v1628_v62, %v1626_v44  ;;  %v1503_v47 = vmul.f32 %v1471_v20, %v1238_v21  ;;  %v1629_v29 = vmul.f32 %v3591_v34, %v1501_v4  ;;  %v1649_v4 = vld [vmem:[#allocation2 + $0x60] sm:$0xff] }
 0x1f2   : > { %v1630_v12 = vmul.f32 %v3591_v34, %v1502_v19  ;;  %v1647_v19 = vld [vmem:[#allocation2 + $0xe8] sm:$0xff] }
 0x1f3   : > { %v1504_v58 = vmul.f32 %v1472_v48, %v1240_v55  ;;  %1959 = vmatprep.mubr.bf16.mxu1 %v1680_v6  ;;  %v1631_v52 = vmul.f32 %v3582_v1, %v1503_v47 }
 0x1f4   : > { %1960 = vmatmul.mubr.bf16.gmra.mxu1 %v1679_v13  ;;  %v2914_v22 = vpop.eup %2913  ;;  %v1648_v13 = vld [vmem:[#allocation2 + $0xb8] sm:$0xff] }
 0x1f5   : > { %v1632_v0 = vmul.f32 %v3582_v1, %v1504_v58  ;;  %v1473_v43 = vmul.f32 %v2914_v22, %v3579_v32  ;;  %v1681_v35 = vpack.c.bf16 %v1631_v52, %v1629_v29 }
 0x1f6   : > { %v2916_v63 = vpop.eup %2915 }
 0x1f7   : > { %v1474_v27 = vmul.f32 %v2916_v63, %v3586_v57  ;;  %v1682_v42 = vpack.c.bf16 %v1632_v0, %v1630_v12  ;;  %v1505_v1 = vmul.f32 %v1473_v43, %v1244_v39  ;;  %v1603_v57 = vpop.permute.xlu1 %1602  ;;  %v1645_v39 = vld [vmem:[#allocation2 + $0x80] sm:$0xff]  ;;  %v1650_v0 = vld [vmem:[#allocation2 + $0xf0] sm:$0xff] }
 0x1f8   : > { %v2918_v8 = vpop.eup %2917 }
 0x1f9   : > { %v2920_v61 = vpop.eup %2919  ;;  %v1475_v46 = vmul.f32 %v2918_v8, %v3594_v38  ;;  %1969 = vmatprep.mubr.bf16.mxu1 %v1682_v42  ;;  %v1506_v18 = vmul.f32 %v1474_v27, %v1246_v16  ;;  %v1633_v21 = vmul.f32 %v1598_v54, %v1505_v1  ;;  %v1637_v38 = vld [vmem:[#allocation2 + $0xb0] sm:$0xff]  ;;  %v1651_v27 = vld [vmem:[#allocation2 + $0x8] sm:$0xff]  ;;  %v1652_v8 = vld [vmem:[#allocation2 + $0x78] sm:$0xff] }
 0x1fa   : > { %v1476_v53 = vmul.f32 %v2920_v61, %v3599_v28  ;;  %v1638_v28 = vld [vmem:[#allocation2] sm:$0xff] }
 0x1fb   : > { %v1507_v41 = vmul.f32 %v1475_v46, %v1248_v60  ;;  %v1634_v3 = vmul.f32 %v1598_v54, %v1506_v18  ;;  %v1653_v46 = vld [vmem:[#allocation2 + $0x38] sm:$0xff] }
 0x1fc   : > { %v1508_v40 = vmul.f32 %v1476_v53, %v1250_v56  ;;  %1970 = vmatmul.mubr.bf16.gmra.mxu1 %v1681_v35  ;;  %v1654_v18 = vld [vmem:[#allocation2 + $0x58] sm:$0xff]  ;;  %v1655_v56 = vld [vmem:[#allocation2 + $0x40] sm:$0xff] }
 0x1fd   : > { %v1635_v11 = vmul.f32 %v1603_v57, %v1507_v41 }
 0x1fe   : > { %v1636_v32 = vmul.f32 %v1603_v57, %v1508_v40  ;;  %v1656_v57 = vld [vmem:[#allocation2 + $0xc8] sm:$0xff] }
 0x1ff   : > { %v1683_v37 = vpack.c.bf16 %v1635_v11, %v1633_v21 }
 0x200   : > { %v1684_v34 = vpack.c.bf16 %v1636_v32, %v1634_v3  ;;  %v1657_v32 = vld [vmem:[#allocation2 + $0xe0] sm:$0xff] }
 0x202   : > { %1979 = vmatprep.mubr.bf16.mxu1 %v1684_v34  ;;  %v1658_v34 = vld [vmem:[#allocation2 + $0x90] sm:$0xff] }
 0x204   : > { %1980 = vmatmul.mubr.bf16.gmra.mxu1 %v1683_v37 }
 0x288   : > { %v1911_v30 = vpop.f32.mrf.mxu0 }
 0x289   : > { %v1990_v25 = vadd.f32 %v1911_v30, %v1637_v38  ;;  %v1659_v30 = vld [vmem:[#allocation2 + $0x70] sm:$0xff] }
 0x28a   : > { %v1913_v59 = vpop.f32.mrf.mxu0 }
 0x28b   : > { %2022 = vst [vmem:[#allocation2 + $0xb0] sm:$0xff] %v1990_v25  ;;  %v1991_v49 = vadd.f32 %v1913_v59, %v1638_v28  ;;  %v1660_v59 = vld [vmem:[#allocation2 + $0xc0] sm:$0xff] }
 0x28c   : > { %v1915_v23 = vpop.f32.mrf.mxu0 }
 0x28d   : > { %2023 = vst [vmem:[#allocation2] sm:$0xff] %v1991_v49  ;;  %v1992_v7 = vadd.f32 %v1915_v23, %v1639_v36  ;;  %v1661_v23 = vld [vmem:[#allocation2 + $0xa8] sm:$0xff] }
 0x28e   : > { %v1917_v45 = vpop.f32.mrf.mxu0 }
 0x28f   : > { %2024 = vst [vmem:[#allocation2 + $0xd8] sm:$0xff] %v1992_v7  ;;  %v1993_v50 = vadd.f32 %v1917_v45, %v1640_v26  ;;  %v1662_v45 = vld [vmem:[#allocation2 + $0xd0] sm:$0xff] }
 0x291   : > { %v1921_v55 = vpop.f32.mrf.mxu0  ;;  %2025 = vst [vmem:[#allocation2 + $0x18] sm:$0xff] %v1993_v50 }
 0x292   : > { %v1994_v33 = vadd.f32 %v1921_v55, %v1641_v5  ;;  %v1663_v55 = vld [vmem:[#allocation2 + $0x10] sm:$0xff] }
 0x293   : > { %v1923_v2 = vpop.f32.mrf.mxu0 }
 0x294   : > { %2026 = vst [vmem:[#allocation2 + $0x50] sm:$0xff] %v1994_v33  ;;  %v1995_v9 = vadd.f32 %v1923_v2, %v1642_v51  ;;  %v1664_v2 = vld [vmem:[#allocation2 + $0x28] sm:$0xff] }
 0x295   : > { %v1925_v24 = vpop.f32.mrf.mxu0 }
 0x296   : > { %2027 = vst [vmem:[#allocation2 + $0x68] sm:$0xff] %v1995_v9  ;;  %v1996_v20 = vadd.f32 %v1925_v24, %v1643_v31  ;;  %v1665_v24 = vld [vmem:[#allocation2 + $0xa0] sm:$0xff] }
 0x297   : > { %v1927_v44 = vpop.f32.mrf.mxu0 }
 0x298   : > { %2028 = vst [vmem:[#allocation2 + $0x30] sm:$0xff] %v1996_v20  ;;  %v1997_v62 = vadd.f32 %v1927_v44, %v1644_v15  ;;  %v1666_v44 = vld [vmem:[#allocation2 + $0xf8] sm:$0xff] }
 0x29a   : > { %2029 = vst [vmem:[#allocation2 + $0x48] sm:$0xff] %v1997_v62  ;;  %v1931_v10 = vpop.f32.mrf.mxu0 }
 0x29b   : > { %v1998_v17 = vadd.f32 %v1931_v10, %v1645_v39  ;;  %v1667_v10 = vld [vmem:[#allocation2 + $0x20] sm:$0xff] }
 0x29c   : > { %v1933_v48 = vpop.f32.mrf.mxu0 }
 0x29d   : > { %2030 = vst [vmem:[#allocation2 + $0x80] sm:$0xff] %v1998_v17  ;;  %v1999_v6 = vadd.f32 %v1933_v48, %v1646_v14  ;;  %v1668_v48 = vld [vmem:[#allocation2 + $0x98] sm:$0xff] }
 0x29e   : > { %v1935_v47 = vpop.f32.mrf.mxu0 }
 0x29f   : > { %2031 = vst [vmem:[#allocation2 + $0x88] sm:$0xff] %v1999_v6  ;;  %v2000_v58 = vadd.f32 %v1935_v47, %v1647_v19 }
 0x2a0   : > { %v1937_v16 = vpop.f32.mrf.mxu0 }
 0x2a1   : > { %2032 = vst [vmem:[#allocation2 + $0xe8] sm:$0xff] %v2000_v58  ;;  %v2001_v22 = vadd.f32 %v1937_v16, %v1648_v13 }
 0x2a2   : > { %v1941_v12 = vpop.f32.mrf.mxu0 }
 0x2a3   : > { %2033 = vst [vmem:[#allocation2 + $0xb8] sm:$0xff] %v2001_v22  ;;  %v2002_v63 = vadd.f32 %v1941_v12, %v1649_v4 }
 0x2a4   : > { %v1943_v52 = vpop.f32.mrf.mxu0 }
 0x2a5   : > { %2034 = vst [vmem:[#allocation2 + $0x60] sm:$0xff] %v2002_v63  ;;  %v2003_v60 = vadd.f32 %v1943_v52, %v1650_v0 }
 0x2a6   : > { %v1945_v42 = vpop.f32.mrf.mxu0 }
 0x2a7   : > { %2035 = vst [vmem:[#allocation2 + $0xf0] sm:$0xff] %v2003_v60  ;;  %v2004_v43 = vadd.f32 %v1945_v42, %v1651_v27 }
 0x2a8   : > { %v1947_v29 = vpop.f32.mrf.mxu0 }
 0x2a9   : > { %2036 = vst [vmem:[#allocation2 + $0x8] sm:$0xff] %v2004_v43  ;;  %v2005_v61 = vadd.f32 %v1947_v29, %v1652_v8 }
 0x2ab   : > { %2037 = vst [vmem:[#allocation2 + $0x78] sm:$0xff] %v2005_v61  ;;  %v1951_v53 = vpop.f32.mrf.mxu1 }
 0x2ac   : > { %v2006_v35 = vadd.f32 %v1951_v53, %v1653_v46 }
 0x2ad   : > { %v1953_v41 = vpop.f32.mrf.mxu1 }
 0x2ae   : > { %2038 = vst [vmem:[#allocation2 + $0x38] sm:$0xff] %v2006_v35  ;;  %v2007_v1 = vadd.f32 %v1953_v41, %v1654_v18 }
 0x2af   : > { %v1955_v40 = vpop.f32.mrf.mxu1 }
 0x2b0   : > { %2039 = vst [vmem:[#allocation2 + $0x58] sm:$0xff] %v2007_v1  ;;  %v2008_v54 = vadd.f32 %v1955_v40, %v1655_v56 }
 0x2b1   : > { %v1957_v3 = vpop.f32.mrf.mxu1 }
 0x2b2   : > { %2040 = vst [vmem:[#allocation2 + $0x40] sm:$0xff] %v2008_v54  ;;  %v2009_v11 = vadd.f32 %v1957_v3, %v1656_v57 }
 0x2b4   : > { %2041 = vst [vmem:[#allocation2 + $0xc8] sm:$0xff] %v2009_v11  ;;  %v1961_v21 = vpop.f32.mrf.mxu1 }
 0x2b5   : > { %v2010_v37 = vadd.f32 %v1961_v21, %v1657_v32 }
 0x2b6   : > { %v1963_v38 = vpop.f32.mrf.mxu1 }
 0x2b7   : > { %2042 = vst [vmem:[#allocation2 + $0xe0] sm:$0xff] %v2010_v37  ;;  %v2011_v28 = vadd.f32 %v1963_v38, %v1658_v34 }
 0x2b8   : > { %v1965_v25 = vpop.f32.mrf.mxu1 }
 0x2b9   : > { %2043 = vst [vmem:[#allocation2 + $0x90] sm:$0xff] %v2011_v28  ;;  %v2012_v36 = vadd.f32 %v1965_v25, %v1659_v30 }
 0x2ba   : > { %v1967_v49 = vpop.f32.mrf.mxu1 }
 0x2bb   : > { %2044 = vst [vmem:[#allocation2 + $0x70] sm:$0xff] %v2012_v36  ;;  %v2013_v26 = vadd.f32 %v1967_v49, %v1660_v59 }
 0x2bc   : > { %v1971_v7 = vpop.f32.mrf.mxu1 }
 0x2bd   : > { %2045 = vst [vmem:[#allocation2 + $0xc0] sm:$0xff] %v2013_v26  ;;  %v2014_v5 = vadd.f32 %v1971_v7, %v1661_v23 }
 0x2be   : > { %v1973_v50 = vpop.f32.mrf.mxu1 }
 0x2bf   : > { %2046 = vst [vmem:[#allocation2 + $0xa8] sm:$0xff] %v2014_v5  ;;  %v2015_v51 = vadd.f32 %v1973_v50, %v1662_v45 }
 0x2c0   : > { %v1975_v33 = vpop.f32.mrf.mxu1 }
 0x2c1   : > { %2047 = vst [vmem:[#allocation2 + $0xd0] sm:$0xff] %v2015_v51  ;;  %v2016_v31 = vadd.f32 %v1975_v33, %v1663_v55 }
 0x2c2   : > { %v1977_v9 = vpop.f32.mrf.mxu1 }
 0x2c3   : > { %2048 = vst [vmem:[#allocation2 + $0x10] sm:$0xff] %v2016_v31  ;;  %v2017_v15 = vadd.f32 %v1977_v9, %v1664_v2 }
 0x2c4   : > { %v1981_v20 = vpop.f32.mrf.mxu1 }
 0x2c5   : > { %2049 = vst [vmem:[#allocation2 + $0x28] sm:$0xff] %v2017_v15  ;;  %v2018_v62 = vadd.f32 %v1981_v20, %v1665_v24 }
 0x2c6   : > { %v1983_v39 = vpop.f32.mrf.mxu1 }
 0x2c7   : > { %2050 = vst [vmem:[#allocation2 + $0xa0] sm:$0xff] %v2018_v62  ;;  %v2019_v14 = vadd.f32 %v1983_v39, %v1666_v44 }
 0x2c8   : > { %v1985_v17 = vpop.f32.mrf.mxu1 }
 0x2c9   : > { %2051 = vst [vmem:[#allocation2 + $0xf8] sm:$0xff] %v2019_v14  ;;  %v2020_v19 = vadd.f32 %v1985_v17, %v1667_v10 }
 0x2ca   : > { %v1987_v6 = vpop.f32.mrf.mxu1 }
 0x2cb   : > { %2052 = vst [vmem:[#allocation2 + $0x20] sm:$0xff] %v2020_v19  ;;  %v2021_v47 = vadd.f32 %v1987_v6, %v1668_v48 }
 0x2cd   : > { %2053 = vst [vmem:[#allocation2 + $0x98] sm:$0xff] %v2021_v47 }
 0x2ce PF: > { %p2494_p1 = scmp.ne.s32.totalorder %s2985_s7, 1 }
 0x2d0   : > { %2057 = sbr.rel (%p2494_p1) target bundleno = 740 (0x2e4), region = 71 }
 0x2d5   : > { %v2058_v13 = vld [vmem:[#allocation2 + $0xb0] sm:$0xff]  ;;  %v2059_v58 = vld [vmem:[#allocation2] sm:$0xff]  ;;  %v2060_v16 = vld [vmem:[#allocation2 + $0xd8] sm:$0xff] }
 0x2d6   : > { %v2515_v4 = vpack.c.bf16 %v2059_v58, %v2058_v13  ;;  %v2061_v22 = vld [vmem:[#allocation2 + $0x18] sm:$0xff]  ;;  %v2062_v12 = vld [vmem:[#allocation2 + $0x50] sm:$0xff]  ;;  %v2063_v0 = vld [vmem:[#allocation2 + $0x68] sm:$0xff] }
 0x2d7   : > { %v2516_v63 = vpack.c.bf16 %v2061_v22, %v2060_v16  ;;  %v2517_v52 = vpack.c.bf16 %v2063_v0, %v2062_v12  ;;  %v2064_v27 = vld [vmem:[#allocation2 + $0x30] sm:$0xff]  ;;  %v2065_v60 = vld [vmem:[#allocation2 + $0x48] sm:$0xff]  ;;  %v2066_v42 = vld [vmem:[#allocation2 + $0x80] sm:$0xff] }
 0x2d8   : > { %2186 = vst [vmem:[%s3271_s21] sm:$0xff] %v2515_v4  ;;  %v2518_v8 = vpack.c.bf16 %v2065_v60, %v2064_v27  ;;  %v2067_v43 = vld [vmem:[#allocation2 + $0x88] sm:$0xff]  ;;  %v2069_v61 = vld [vmem:[#allocation2 + $0xb8] sm:$0xff]  ;;  %v2070_v18 = vld [vmem:[#allocation2 + $0x60] sm:$0xff] }
 0x2d9   : > { %v2068_v29 = vld [vmem:[#allocation2 + $0xe8] sm:$0xff]  ;;  %2187 = vst [vmem:[%s3271_s21 + $0x8] sm:$0xff] %v2516_v63  ;;  %2188 = vst [vmem:[%s3271_s21 + $0x10] sm:$0xff] %v2517_v52  ;;  %v2519_v46 = vpack.c.bf16 %v2067_v43, %v2066_v42  ;;  %v2071_v35 = vld [vmem:[#allocation2 + $0xf0] sm:$0xff] }
 0x2da   : > { %v2520_v53 = vpack.c.bf16 %v2069_v61, %v2068_v29  ;;  %v2072_v41 = vld [vmem:[#allocation2 + $0x8] sm:$0xff]  ;;  %2189 = vst [vmem:[%s3271_s21 + $0x18] sm:$0xff] %v2518_v8  ;;  %v2521_v56 = vpack.c.bf16 %v2071_v35, %v2070_v18  ;;  %v2073_v1 = vld [vmem:[#allocation2 + $0x78] sm:$0xff]  ;;  %v2076_v11 = vld [vmem:[#allocation2 + $0x40] sm:$0xff] }
 0x2db   : > { %v2074_v40 = vld [vmem:[#allocation2 + $0x38] sm:$0xff]  ;;  %2190 = vst [vmem:[%s3271_s21 + $0x20] sm:$0xff] %v2519_v46  ;;  %v2522_v54 = vpack.c.bf16 %v2073_v1, %v2072_v41  ;;  %v2077_v32 = vld [vmem:[#allocation2 + $0xc8] sm:$0xff]  ;;  %v2078_v21 = vld [vmem:[#allocation2 + $0xe0] sm:$0xff] }
 0x2dc   : > { %v2075_v57 = vld [vmem:[#allocation2 + $0x58] sm:$0xff]  ;;  %2191 = vst [vmem:[%s3271_s21 + $0x28] sm:$0xff] %v2520_v53  ;;  %2192 = vst [vmem:[%s3271_s21 + $0x30] sm:$0xff] %v2521_v56  ;;  %v2524_v34 = vpack.c.bf16 %v2077_v32, %v2076_v11  ;;  %v2079_v37 = vld [vmem:[#allocation2 + $0x90] sm:$0xff] }
 0x2dd   : > { %v2523_v3 = vpack.c.bf16 %v2075_v57, %v2074_v40  ;;  %v2080_v38 = vld [vmem:[#allocation2 + $0x70] sm:$0xff]  ;;  %v2081_v30 = vld [vmem:[#allocation2 + $0xc0] sm:$0xff]  ;;  %2193 = vst [vmem:[%s3271_s21 + $0x38] sm:$0xff] %v2522_v54  ;;  %v2525_v28 = vpack.c.bf16 %v2079_v37, %v2078_v21  ;;  %v2082_v59 = vld [vmem:[#allocation2 + $0xa8] sm:$0xff] }
 0x2de   : > { %v2526_v25 = vpack.c.bf16 %v2081_v30, %v2080_v38  ;;  %v2083_v36 = vld [vmem:[#allocation2 + $0xd0] sm:$0xff]  ;;  %2195 = vst [vmem:[%s3271_s21 + $0x48] sm:$0xff] %v2524_v34  ;;  %v2085_v26 = vld [vmem:[#allocation2 + $0x28] sm:$0xff]  ;;  %v2086_v7 = vld [vmem:[#allocation2 + $0xa0] sm:$0xff] }
 0x2df   : > { %2194 = vst [vmem:[%s3271_s21 + $0x40] sm:$0xff] %v2523_v3  ;;  %v2084_v49 = vld [vmem:[#allocation2 + $0x10] sm:$0xff]  ;;  %v2527_v23 = vpack.c.bf16 %v2083_v36, %v2082_v59  ;;  %v2087_v45 = vld [vmem:[#allocation2 + $0xf8] sm:$0xff]  ;;  %2196 = vst [vmem:[%s3271_s21 + $0x50] sm:$0xff] %v2525_v28 }
 0x2e0   : > { %2197 = vst [vmem:[%s3271_s21 + $0x58] sm:$0xff] %v2526_v25  ;;  %v2528_v5 = vpack.c.bf16 %v2085_v26, %v2084_v49  ;;  %v2529_v50 = vpack.c.bf16 %v2087_v45, %v2086_v7  ;;  %v2088_v55 = vld [vmem:[#allocation2 + $0x20] sm:$0xff]  ;;  %v2089_v51 = vld [vmem:[#allocation2 + $0x98] sm:$0xff] }
 0x2e1   : > { %2198 = vst [vmem:[%s3271_s21 + $0x60] sm:$0xff] %v2527_v23  ;;  %v2530_v33 = vpack.c.bf16 %v2089_v51, %v2088_v55 }
 0x2e2   : > { %2199 = vst [vmem:[%s3271_s21 + $0x68] sm:$0xff] %v2528_v5  ;;  %2200 = vst [vmem:[%s3271_s21 + $0x70] sm:$0xff] %v2529_v50 }
 0x2e3   : > { %2201 = vst [vmem:[%s3271_s21 + $0x78] sm:$0xff] %v2530_v33 }
 0x2e4 PF: > { %s26_s11 = sadd.s32 1, %s3001_s11   ;;  %s3700_s1 = smov %s2981_s30 }
 0x2e5   : > { %p23_p2 = scmp.ge.s32.totalorder %s26_s11, 26   ;;  %s3701_s30 = smov %s3105_s25 }
 0x2e6   : > { %s3702_s7 = smov %s2993_s9  ;;  %s3703_s8 = smov %s2997_s10 }
 0x2e7   : > { %s3704_s9 = smov %s3711_s12  ;;  %s3705_s10 = smov %s3709_s13 }
 0x2e8   :  { %25 = sbr.rel (!%p23_p2) target bundleno = 30 (0x1e), region = 115 }

</bundles_post_ra>
